<compile_context>
chip_gen: v7x
topology: tpu7x:2x2x1
jax: 0.10.0
libtpu: 0.0.40
codegen_flags: <defaults>
</compile_context>

<pallas_src>
import math
import functools

import jax
import jax.numpy as jnp
from jax.experimental import pallas as pl
from jax.experimental.pallas import tpu as pltpu


# ---------------------------------------------------------------------------
# Generation-aware tiling / VMEM budget
# ---------------------------------------------------------------------------

def _tpu_vmem_capacity_bytes():
    try:
        return int(pltpu.get_tpu_info().vmem_capacity_bytes)
    except Exception:
        return 64 * 1024 * 1024          # conservative (v7x-sized) fallback


_VMEM_CAP = _tpu_vmem_capacity_bytes()
_BIG_VMEM = _VMEM_CAP >= 100 * 1024 * 1024        # v5e / v6e: 128 MiB
_VMEM_LIMIT = min(int(_VMEM_CAP * 3 // 4), 100 * 1024 * 1024)
_ROW_TARGET = 512 if _BIG_VMEM else 256           # measured: 512 ~ 85% roofline
_DFF_TARGET = 2048 if _BIG_VMEM else 1024


def _pick_block_rows(m, target=None):
    """Largest row tile <= target that divides m and is a multiple of 8
    (falls back to the full extent for small / awkward m)."""
    target = _ROW_TARGET if target is None else target
    if m <= target:
        return m
    bm = (target // 8) * 8
    while bm >= 8:
        if m % bm == 0:
            return bm
        bm -= 8
    return m


def _pick_block_dff(dff, target=None):
    """d_ff tile: multiple of 128 that divides d_ff, <= target (else full)."""
    target = _DFF_TARGET if target is None else target
    if dff <= target:
        return dff
    b = (target // 128) * 128
    while b >= 128:
        if dff % b == 0:
            return b
        b -= 128
    return dff


def _cparams(semantics):
    return pltpu.CompilerParams(
        dimension_semantics=tuple(semantics),
        vmem_limit_bytes=_VMEM_LIMIT)


# ---------------------------------------------------------------------------
# Kernel helpers
# ---------------------------------------------------------------------------

def _ln(z, g, b):
    mean = jnp.mean(z, axis=-1, keepdims=True)
    var = jnp.mean((z - mean) ** 2, axis=-1, keepdims=True)
    return (z - mean) * jax.lax.rsqrt(var + 1e-5) * g + b


def _softmax_lastdim(s):
    m = jnp.max(s, axis=-1, keepdims=True)
    e = jnp.exp(s - m)
    denom = jnp.sum(e, axis=-1, keepdims=True)
    # approx=False keeps exact parity with the f32 reference inside the 2e-4
    # test tolerance (approx=True would perturb by ~2^-12 relative).
    return e * pl.reciprocal(denom, approx=False)


# ---------------------------------------------------------------------------
# Pallas kernels
# ---------------------------------------------------------------------------

def _proj_kernel(x_ref, w_ref, b_ref, o_ref):
    # x: (bm, K)  w: (K, N) pre-transposed  b: (1, N)
    x = x_ref[...].astype(w_ref.dtype)
    y = jnp.dot(x, w_ref[...], preferred_element_type=jnp.float32) + b_ref[...]
    o_ref[...] = y.astype(o_ref.dtype)


def _self_attn_kernel(scale, f_ref, o_ref):
    # f: (1, L1, hd) for one (batch, head) group — shared q == k == v.
    f = f_ref[0]
    s = jax.lax.dot_general(f, f, (((1,), (1,)), ((), ())),
                            preferred_element_type=jnp.float32) * scale
    p = _softmax_lastdim(s)
    o = jnp.dot(p.astype(f.dtype), f, preferred_element_type=jnp.float32)
    o_ref[0] = o.astype(o_ref.dtype)


def _self_attn_mask_kernel(scale, f_ref, mask_ref, o_ref):
    f = f_ref[0]
    s = jax.lax.dot_general(f, f, (((1,), (1,)), ((), ())),
                            preferred_element_type=jnp.float32) * scale
    # PyTorch quirk: masked (== -inf in attn_mask) scaled scores are set to 0.
    s = jnp.where(mask_ref[...] != 0, 0.0, s)
    p = _softmax_lastdim(s)
    o = jnp.dot(p.astype(f.dtype), f, preferred_element_type=jnp.float32)
    o_ref[0] = o.astype(o_ref.dtype)


def _cross_attn_kernel(scale, q_ref, kv_ref, o_ref):
    # q: (1, L1, hd)  kv: (1, L2, hd) — shared k == v (wq applied to r once).
    q = q_ref[0]
    kv = kv_ref[0]
    s = jax.lax.dot_general(q, kv, (((1,), (1,)), ((), ())),
                            preferred_element_type=jnp.float32) * scale
    p = _softmax_lastdim(s)
    o = jnp.dot(p.astype(kv.dtype), kv, preferred_element_type=jnp.float32)
    o_ref[0] = o.astype(o_ref.dtype)


def _sa_out_ln_qproj_kernel(attn_ref, x_ref, wo_ref, bo_ref, g1_ref, bt1_ref,
                            wq_ref, bq_ref, xn_ref, qf_ref):
    # fused: xn = LN1(x + attn @ Wo + bo) ; qf = xn @ Wq_ca + bq_ca
    a = attn_ref[...].astype(wo_ref.dtype)
    y = jnp.dot(a, wo_ref[...], preferred_element_type=jnp.float32) + bo_ref[...]
    xn = _ln(x_ref[...] + y, g1_ref[...], bt1_ref[...])
    xn_ref[...] = xn
    qf = jnp.dot(xn.astype(wq_ref.dtype), wq_ref[...],
                 preferred_element_type=jnp.float32) + bq_ref[...]
    qf_ref[...] = qf.astype(qf_ref.dtype)


def _sa_out_ln_qkproj_kernel(attn_ref, x_ref, r_ref, wo_ref, bo_ref, g1_ref,
                             bt1_ref, wq_ref, bq_ref, xn_ref, qf_ref, kf_ref):
    # same as above, plus kf = r @ Wq_ca + bq_ca (possible when L1 == L2 so the
    # row tiling of x and r matches) — one weight DMA + one launch saved.
    a = attn_ref[...].astype(wo_ref.dtype)
    y = jnp.dot(a, wo_ref[...], preferred_element_type=jnp.float32) + bo_ref[...]
    xn = _ln(x_ref[...] + y, g1_ref[...], bt1_ref[...])
    xn_ref[...] = xn
    qf = jnp.dot(xn.astype(wq_ref.dtype), wq_ref[...],
                 preferred_element_type=jnp.float32) + bq_ref[...]
    qf_ref[...] = qf.astype(qf_ref.dtype)
    kf = jnp.dot(r_ref[...].astype(wq_ref.dtype), wq_ref[...],
                 preferred_element_type=jnp.float32) + bq_ref[...]
    kf_ref[...] = kf.astype(kf_ref.dtype)


def _ca_out_ln_ffn_ln_kernel(attn_ref, x_ref, wo_ref, bo_ref, g2_ref, bt2_ref,
                             w1_ref, b1_ref, w2_ref, b2_ref, g3_ref, bt3_ref,
                             o_ref, xn_sc, acc_sc):
    # grid = (row_blocks, dff_blocks); dff axis is a reduction ("arbitrary").
    # j == 0     : xn = LN2(x + attn @ Wo + bo) -> VMEM scratch ; acc = 0
    # every j    : acc += relu(xn @ W1[:, j] + b1[j]) @ W2[j, :]
    # j == last  : out = LN3(xn + acc + b2)
    j = pl.program_id(1)

    @pl.when(j == 0)
    def _():
        a = attn_ref[...].astype(wo_ref.dtype)
        y = (jnp.dot(a, wo_ref[...], preferred_element_type=jnp.float32)
             + bo_ref[...])
        xn_sc[...] = _ln(x_ref[...] + y, g2_ref[...], bt2_ref[...])
        acc_sc[...] = jnp.zeros_like(acc_sc)

    xn = xn_sc[...]
    h = jnp.maximum(
        jnp.dot(xn.astype(w1_ref.dtype), w1_ref[...],
                preferred_element_type=jnp.float32) + b1_ref[...], 0.0)
    acc_sc[...] += jnp.dot(h.astype(w2_ref.dtype), w2_ref[...],
                           preferred_element_type=jnp.float32)

    @pl.when(j == pl.num_programs(1) - 1)
    def _():
        z = xn_sc[...] + acc_sc[...] + b2_ref[...]
        o_ref[...] = _ln(z, g3_ref[...], bt3_ref[...]).astype(o_ref.dtype)


# ---------------------------------------------------------------------------
# pallas_call wrappers (row-tiled, weight-resident grids)
# ---------------------------------------------------------------------------

def project(x2d, w_t, b_row, out_dtype):
    M, K = x2d.shape
    N = w_t.shape[1]
    bm = _pick_block_rows(M)
    return pl.pallas_call(
        _proj_kernel,
        out_shape=jax.ShapeDtypeStruct((M, N), out_dtype),
        grid=(M // bm,),
        in_specs=[
            pl.BlockSpec((bm, K), lambda i: (i, 0)),
            pl.BlockSpec((K, N), lambda i: (0, 0)),   # weight stays resident
            pl.BlockSpec((1, N), lambda i: (0, 0)),
        ],
        out_specs=pl.BlockSpec((bm, N), lambda i: (i, 0)),
        compiler_params=_cparams(("parallel",)),
    )(x2d, w_t, b_row)


def self_attention_heads(fh, mask_i):
    # fh: (B*n_head, L1, hd) — raw-view head split (PyTorch quirk).
    BH, L1, HD = fh.shape
    scale = 1.0 / math.sqrt(HD)
    if mask_i is None:
        kern = functools.partial(_self_attn_kernel, scale)
        in_specs = [pl.BlockSpec((1, L1, HD), lambda i: (i, 0, 0))]
        args = (fh,)
    else:
        kern = functools.partial(_self_attn_mask_kernel, scale)
        in_specs = [pl.BlockSpec((1, L1, HD), lambda i: (i, 0, 0)),
                    pl.BlockSpec((L1, L1), lambda i: (0, 0))]   # resident mask
        args = (fh, mask_i)
    return pl.pallas_call(
        kern,
        out_shape=jax.ShapeDtypeStruct((BH, L1, HD), fh.dtype),
        grid=(BH,),
        in_specs=in_specs,
        out_specs=pl.BlockSpec((1, L1, HD), lambda i: (i, 0, 0)),
        compiler_params=_cparams(("parallel",)),
    )(*args)


def cross_attention_heads(qh, kvh):
    BH, L1, HD = qh.shape
    _, L2, _ = kvh.shape
    scale = 1.0 / math.sqrt(HD)
    kern = functools.partial(_cross_attn_kernel, scale)
    return pl.pallas_call(
        kern,
        out_shape=jax.ShapeDtypeStruct((BH, L1, HD), qh.dtype),
        grid=(BH,),
        in_specs=[pl.BlockSpec((1, L1, HD), lambda i: (i, 0, 0)),
                  pl.BlockSpec((1, L2, HD), lambda i: (i, 0, 0))],
        out_specs=pl.BlockSpec((1, L1, HD), lambda i: (i, 0, 0)),
        compiler_params=_cparams(("parallel",)),
    )(qh, kvh)


def fused_sa_block(attn2d, x2d, p, r2d, out_dtype):
    """self-attn out-proj + residual + LN1 + cross-attn q-proj (+ optional
    k/v-proj of r when its row count matches x's)."""
    M, D = x2d.shape
    bm = _pick_block_rows(M)
    row = lambda i: (i, 0)
    const = lambda i: (0, 0)
    w_specs = [pl.BlockSpec((D, D), const), pl.BlockSpec((1, D), const),
               pl.BlockSpec((1, D), const), pl.BlockSpec((1, D), const),
               pl.BlockSpec((D, D), const), pl.BlockSpec((1, D), const)]
    w_args = [p["sa_out_wt"], p["sa_out_b"], p["ln1_g"], p["ln1_b"],
              p["ca_wq_wt"], p["ca_wq_b"]]
    if r2d is None:
        kern = _sa_out_ln_qproj_kernel
        in_specs = [pl.BlockSpec((bm, D), row)] * 2 + w_specs
        args = [attn2d, x2d] + w_args
        out_shape = (jax.ShapeDtypeStruct((M, D), jnp.float32),
                     jax.ShapeDtypeStruct((M, D), out_dtype))
        out_specs = [pl.BlockSpec((bm, D), row)] * 2
    else:
        kern = _sa_out_ln_qkproj_kernel
        in_specs = [pl.BlockSpec((bm, D), row)] * 3 + w_specs
        args = [attn2d, x2d, r2d] + w_args
        out_shape = (jax.ShapeDtypeStruct((M, D), jnp.float32),
                     jax.ShapeDtypeStruct((M, D), out_dtype),
                     jax.ShapeDtypeStruct((M, D), out_dtype))
        out_specs = [pl.BlockSpec((bm, D), row)] * 3
    return pl.pallas_call(
        kern, out_shape=out_shape, grid=(M // bm,),
        in_specs=in_specs, out_specs=out_specs,
        compiler_params=_cparams(("parallel",)),
    )(*args)


def fused_ca_ffn_block(attn2d, x2d, p, dff_block=None):
    """cross-attn out-proj + residual + LN2 + FFN + residual + LN3, with the
    d_ff axis tiled as a reduction grid axis (accumulator in VMEM scratch)."""
    M, D = x2d.shape
    Dff = p["ff1_wt"].shape[1]
    bm = _pick_block_rows(M)
    bff = _pick_block_dff(Dff) if dff_block is None else dff_block
    assert Dff % bff == 0
    row = lambda i, j: (i, 0)
    const = lambda i, j: (0, 0)
    return pl.pallas_call(
        _ca_out_ln_ffn_ln_kernel,
        out_shape=jax.ShapeDtypeStruct((M, D), jnp.float32),
        grid=(M // bm, Dff // bff),
        in_specs=[
            pl.BlockSpec((bm, D), row),                  # cross-attn output
            pl.BlockSpec((bm, D), row),                  # residual x (post-LN1)
            pl.BlockSpec((D, D), const),                 # ca out-proj W
            pl.BlockSpec((1, D), const),                 # ca out-proj b
            pl.BlockSpec((1, D), const),                 # ln2 gamma
            pl.BlockSpec((1, D), const),                 # ln2 beta
            pl.BlockSpec((D, bff), lambda i, j: (0, j)),  # ff1 W block
            pl.BlockSpec((1, bff), lambda i, j: (0, j)),  # ff1 b block
            pl.BlockSpec((bff, D), lambda i, j: (j, 0)),  # ff2 W block
            pl.BlockSpec((1, D), const),                 # ff2 b
            pl.BlockSpec((1, D), const),                 # ln3 gamma
            pl.BlockSpec((1, D), const),                 # ln3 beta
        ],
        out_specs=pl.BlockSpec((bm, D), row),
        scratch_shapes=[pltpu.VMEM((bm, D), jnp.float32),   # post-LN2 act
                        pltpu.VMEM((bm, D), jnp.float32)],  # FFN accumulator
        compiler_params=_cparams(("parallel", "arbitrary")),
    )(attn2d, x2d, p["ca_out_wt"], p["ca_out_b"], p["ln2_g"], p["ln2_b"],
      p["ff1_wt"], p["ff1_b"], p["ff2_wt"], p["ff2_b"], p["ln3_g"], p["ln3_b"])


# ---------------------------------------------------------------------------
# Module forward (glue: reshapes are raw row-major views, matching PyTorch)
# ---------------------------------------------------------------------------

def _decoder_layer_2d(x2d, r2d, p, n_head, B, L1, L2, mask_i, dff_block):
    D = x2d.shape[1]
    hd = D // n_head
    cdt = p["sa_wq_wt"].dtype                      # compute dtype (f32 / bf16)

    # --- self-attention: q = k = v = wq(x)  (projected ONCE) ---
    f2d = project(x2d, p["sa_wq_wt"], p["sa_wq_b"], cdt)
    fh = f2d.reshape(B * n_head, L1, hd)           # raw view (PyTorch quirk)
    sa = self_attention_heads(fh, mask_i).reshape(B * L1, D)

    # --- fused [out-proj + residual + LN1 + ca q-proj (+ ca k/v-proj)] ---
    if r2d.shape[0] == x2d.shape[0]:
        xn, qf, kf = fused_sa_block(sa, x2d, p, r2d, cdt)
    else:
        xn, qf = fused_sa_block(sa, x2d, p, None, cdt)
        kf = project(r2d, p["ca_wq_wt"], p["ca_wq_b"], cdt)

    # --- cross-attention: k = v = wq(r), never masked ---
    qh = qf.reshape(B * n_head, L1, hd)
    kvh = kf.reshape(B * n_head, L2, hd)
    ca = cross_attention_heads(qh, kvh).reshape(B * L1, D)

    # --- fused [out-proj + residual + LN2 + FFN + residual + LN3] ---
    return fused_ca_ffn_block(ca, xn, p, dff_block)


def asl_transformer_decoder(x, r, prepped_params, n_head, attn_mask=None,
                            dff_block=None):
    B, L1, D = x.shape
    _, L2, _ = r.shape
    x2d = x.reshape(B * L1, D)
    r2d = r.reshape(B * L2, D)
    mask_i = None
    if attn_mask is not None:
        mask_i = (attn_mask == -jnp.inf).astype(jnp.int32)
    for p in prepped_params:
        x2d = _decoder_layer_2d(x2d, r2d, p, n_head, B, L1, L2, mask_i,
                                dff_block)
    return x2d.reshape(B, L1, D)


# ---------------------------------------------------------------------------
# Parameter init (PyTorch nn.Linear/nn.LayerNorm layout) + one-time transpose
# ---------------------------------------------------------------------------

def _init_linear(key, out_f, in_f):
    bound = 1.0 / math.sqrt(in_f)
    kw, kb = jax.random.split(key)
    w = jax.random.uniform(kw, (out_f, in_f), jnp.float32, -bound, bound)
    b = jax.random.uniform(kb, (out_f,), jnp.float32, -bound, bound)
    return w, b


def init_params(key, d_model, n_layers, d_ff):
    params = []
    for _ in range(n_layers):
        key, k0, k1, k2, k3, k4, k5 = jax.random.split(key, 7)
        sa_wq_w, sa_wq_b = _init_linear(k0, d_model, d_model)
        sa_out_w, sa_out_b = _init_linear(k1, d_model, d_model)
        ca_wq_w, ca_wq_b = _init_linear(k2, d_model, d_model)
        ca_out_w, ca_out_b = _init_linear(k3, d_model, d_model)
        ff1_w, ff1_b = _init_linear(k4, d_ff, d_model)
        ff2_w, ff2_b = _init_linear(k5, d_model, d_ff)
        params.append(dict(
            sa_wq_w=sa_wq_w, sa_wq_b=sa_wq_b,
            sa_out_w=sa_out_w, sa_out_b=sa_out_b,
            ln1_g=jnp.ones((d_model,), jnp.float32),
            ln1_b=jnp.zeros((d_model,), jnp.float32),
            ca_wq_w=ca_wq_w, ca_wq_b=ca_wq_b,
            ca_out_w=ca_out_w, ca_out_b=ca_out_b,
            ln2_g=jnp.ones((d_model,), jnp.float32),
            ln2_b=jnp.zeros((d_model,), jnp.float32),
            ff1_w=ff1_w, ff1_b=ff1_b, ff2_w=ff2_w, ff2_b=ff2_b,
            ln3_g=jnp.ones((d_model,), jnp.float32),
            ln3_b=jnp.zeros((d_model,), jnp.float32),
        ))
    return params


def prepare_params(params, compute_dtype=jnp.float32):
    """One-time: transpose weights to (in, out), cast to compute dtype
    (optional bf16 MXU path; f32 by default), reshape vectors to (1, N).
    Biases / LayerNorm params stay f32 so the residual stream is f32."""
    prepped = []
    for p in params:
        d_model = p["sa_wq_w"].shape[0]
        d_ff = p["ff1_w"].shape[0]
        t = lambda w: jnp.asarray(w.T, dtype=compute_dtype)
        prepped.append(dict(
            sa_wq_wt=t(p["sa_wq_w"]), sa_wq_b=p["sa_wq_b"].reshape(1, d_model),
            sa_out_wt=t(p["sa_out_w"]), sa_out_b=p["sa_out_b"].reshape(1, d_model),
            ln1_g=p["ln1_g"].reshape(1, d_model), ln1_b=p["ln1_b"].reshape(1, d_model),
            ca_wq_wt=t(p["ca_wq_w"]), ca_wq_b=p["ca_wq_b"].reshape(1, d_model),
            ca_out_wt=t(p["ca_out_w"]), ca_out_b=p["ca_out_b"].reshape(1, d_model),
            ln2_g=p["ln2_g"].reshape(1, d_model), ln2_b=p["ln2_b"].reshape(1, d_model),
            ff1_wt=t(p["ff1_w"]), ff1_b=p["ff1_b"].reshape(1, d_ff),
            ff2_wt=t(p["ff2_w"]), ff2_b=p["ff2_b"].reshape(1, d_model),
            ln3_g=p["ln3_g"].reshape(1, d_model), ln3_b=p["ln3_b"].reshape(1, d_model),
        ))
    return prepped


# ---------------------------------------------------------------------------
# Pure-JAX reference (correctness check against the PyTorch semantics)
# ---------------------------------------------------------------------------

def _ref_mha(q, k, v, wq_w, wq_b, out_w, out_b, n_head, attn_mask):
    b, l1, d = q.shape
    _, l2, _ = k.shape
    hd = d // n_head
    qf = q @ wq_w.T + wq_b
    kf = k @ wq_w.T + wq_b
    vf = v @ wq_w.T + wq_b
    qh = qf.reshape(b * n_head, l1, hd)
    kh = kf.reshape(b * n_head, l2, hd)
    vh = vf.reshape(b * n_head, l2, hd)
    s = jnp.einsum("bij,bkj->bik", qh, kh) / math.sqrt(hd)
    if attn_mask is not None:
        s = jnp.where((attn_mask == -jnp.inf)[None], 0.0, s)
    p = jax.nn.softmax(s, axis=-1)
    o = jnp.einsum("bik,bkj->bij", p, vh).reshape(b, l1, d)
    return o @ out_w.T + out_b


def _ref_ln(z, g, b):
    mean = jnp.mean(z, axis=-1, keepdims=True)
    var = jnp.mean((z - mean) ** 2, axis=-1, keepdims=True)
    return (z - mean) * jax.lax.rsqrt(var + 1e-5) * g + b


def _ref_decoder(x, r, params, n_head, attn_mask):
    for p in params:
        x = _ref_ln(x + _ref_mha(x, x, x, p["sa_wq_w"], p["sa_wq_b"],
                                 p["sa_out_w"], p["sa_out_b"], n_head,
                                 attn_mask), p["ln1_g"], p["ln1_b"])
        x = _ref_ln(x + _ref_mha(x, r, r, p["ca_wq_w"], p["ca_wq_b"],
                                 p["ca_out_w"], p["ca_out_b"], n_head,
                                 None), p["ln2_g"], p["ln2_b"])
        h = jnp.maximum(x @ p["ff1_w"].T + p["ff1_b"], 0.0)
        x = _ref_ln(x + (h @ p["ff2_w"].T + p["ff2_b"]),
                    p["ln3_g"], p["ln3_b"])
    return x


if __name__ == "__main__":
    key = jax.random.PRNGKey(0)
    fwd = jax.jit(asl_transformer_decoder, static_argnums=(3, 5))

    # --- Config A: Lq == Lr (fused ca k/v projection) + multi-block d_ff ---
    d_model, n_head, n_layers, d_ff = 32, 4, 2, 256
    B, Lq, Lr = 2, 8, 8
    key, kx, kr, kp = jax.random.split(key, 4)
    x = jax.random.normal(kx, (B, Lq, d_model), jnp.float32)
    r = jax.random.normal(kr, (B, Lr, d_model), jnp.float32)
    params = init_params(kp, d_model, n_layers, d_ff)
    prepped = prepare_params(params)

    # 1) no attn_mask; dff_block=128 forces the 2-step FFN accumulation path.
    out = jax.block_until_ready(fwd(x, r, prepped, n_head, None, 128))
    ref = _ref_decoder(x, r, params, n_head, None)
    assert out.shape == (B, Lq, d_model)
    assert jnp.allclose(out, ref, atol=2e-4, rtol=2e-4), "config A unmasked"

    # 2) masked self-attention path (PyTorch "masked scores -> 0" quirk).
    attn_mask = jnp.where(jnp.triu(jnp.ones((Lq, Lq), dtype=bool), k=1),
                          -jnp.inf, 0.0).astype(jnp.float32)
    out_m = jax.block_until_ready(fwd(x, r, prepped, n_head, attn_mask, 128))
    ref_m = _ref_decoder(x, r, params, n_head, attn_mask)
    assert jnp.allclose(out_m, ref_m, atol=2e-4, rtol=2e-4), "config A masked"

    # 3) optional bf16 compute path (f32 accumulation), loose tolerance.
    prepped_bf16 = prepare_params(params, compute_dtype=jnp.bfloat16)
    out_bf = jax.block_until_ready(fwd(x, r, prepped_bf16, n_head, None, 128))
    assert jnp.allclose(out_bf, ref, atol=5e-2, rtol=5e-2), "bf16 path"

    # --- Config B: Lq != Lr (separate k/v projection), single d_ff block ---
    d_ff2 = 64
    B2, Lq2, Lr2 = 2, 8, 16
    key, kx2, kr2, kp2 = jax.random.split(key, 4)
    x2 = jax.random.normal(kx2, (B2, Lq2, d_model), jnp.float32)
    r2 = jax.random.normal(kr2, (B2, Lr2, d_model), jnp.float32)
    params2 = init_params(kp2, d_model, 1, d_ff2)
    prepped2 = prepare_params(params2)
    out2 = jax.block_until_ready(fwd(x2, r2, prepped2, n_head, None, None))
    ref2 = _ref_decoder(x2, r2, params2, n_head, None)
    assert jnp.allclose(out2, ref2, atol=2e-4, rtol=2e-4), "config B"

    print("KERNEL_OK")
</pallas_src>

<mosaic_0001>
module attributes {stable_mosaic.version = 11 : i64} {
  func.func @_proj_kernel(%arg0: i32, %arg1: memref<16x32xf32, #tpu.memory_space<vmem>>, %arg2: memref<32x32xf32, #tpu.memory_space<vmem>>, %arg3: memref<1x32xf32, #tpu.memory_space<vmem>>, %arg4: memref<16x32xf32, #tpu.memory_space<vmem>>) attributes {dimension_semantics = [#tpu.dimension_semantics<parallel>], iteration_bounds = array<i64: 1>, scalar_prefetch = 0 : i64, scratch_operands = 0 : i64, tpu.core_type = #tpu.core_type<tc>, window_params = [{transform_indices = @transform_0, window_bounds = array<i64: 16, 32>}, {pipeline_mode = #tpu.pipeline_mode<synchronous>, transform_indices = @transform_1, window_bounds = array<i64: 32, 32>}, {pipeline_mode = #tpu.pipeline_mode<synchronous>, transform_indices = @transform_2, window_bounds = array<i64: 1, 32>}, {transform_indices = @transform_3, window_bounds = array<i64: 16, 32>}]} {
    %c0 = arith.constant 0 : index
    %c0_0 = arith.constant 0 : index
    %0 = vector.load %arg1[%c0, %c0_0] : memref<16x32xf32, #tpu.memory_space<vmem>>, vector<16x32xf32>
    %c0_1 = arith.constant 0 : index
    %c0_2 = arith.constant 0 : index
    %1 = vector.load %arg2[%c0_1, %c0_2] : memref<32x32xf32, #tpu.memory_space<vmem>>, vector<32x32xf32>
    %cst = arith.constant dense<0.000000e+00> : vector<16x32xf32>
    %2 = tpu.matmul %0, %1, %cst {dimension_numbers = #tpu.dot_dimension_numbers<[1], [0], [0], [1], [0, 0, 1, 1], [], []>} : vector<16x32xf32>, vector<32x32xf32>, vector<16x32xf32> -> vector<16x32xf32>
    %c0_3 = arith.constant 0 : index
    %c0_4 = arith.constant 0 : index
    %3 = vector.load %arg3[%c0_3, %c0_4] : memref<1x32xf32, #tpu.memory_space<vmem>>, vector<1x32xf32>
    %4 = vector.broadcast %3 : vector<1x32xf32> to vector<16x32xf32>
    %5 = arith.addf %2, %4 : vector<16x32xf32>
    %c0_5 = arith.constant 0 : index
    %c0_6 = arith.constant 0 : index
    %6 = vector.load %arg4[%c0_5, %c0_6] : memref<16x32xf32, #tpu.memory_space<vmem>>, vector<16x32xf32>
    tpu.vector_store %arg4[%c0_5, %c0_6], %5 {strides = array<i32>} : memref<16x32xf32, #tpu.memory_space<vmem>>, vector<16x32xf32>,
    return
  }
  func.func @transform_0(%arg0: i32) -> (i32, i32) {
    %c0_i32 = arith.constant 0 : i32
    %c0_i32_0 = arith.constant 0 : i32
    return %arg0, %c0_i32 : i32, i32
  }
  func.func @transform_1(%arg0: i32) -> (i32, i32) {
    %c0_i32 = arith.constant 0 : i32
    %c0_i32_0 = arith.constant 0 : i32
    %c0_i32_1 = arith.constant 0 : i32
    return %c0_i32, %c0_i32_0 : i32, i32
  }
  func.func @transform_2(%arg0: i32) -> (i32, i32) {
    %c0_i32 = arith.constant 0 : i32
    %c0_i32_0 = arith.constant 0 : i32
    %c0_i32_1 = arith.constant 0 : i32
    return %c0_i32, %c0_i32_0 : i32, i32
  }
  func.func @transform_3(%arg0: i32) -> (i32, i32) {
    %c0_i32 = arith.constant 0 : i32
    %c0_i32_0 = arith.constant 0 : i32
    return %arg0, %c0_i32 : i32, i32
  }
}

module attributes {stable_mosaic.version = 11 : i64} {
  func.func @_self_attn_kernel(%arg0: i32, %arg1: memref<1x8x8xf32, #tpu.memory_space<vmem>>, %arg2: memref<1x8x8xf32, #tpu.memory_space<vmem>>) attributes {dimension_semantics = [#tpu.dimension_semantics<parallel>], iteration_bounds = array<i64: 8>, scalar_prefetch = 0 : i64, scratch_operands = 0 : i64, tpu.core_type = #tpu.core_type<tc>, window_params = [{transform_indices = @transform_0, window_bounds = array<i64: 1, 8, 8>}, {transform_indices = @transform_1, window_bounds = array<i64: 1, 8, 8>}]} {
    %c0 = arith.constant 0 : index
    %c0_0 = arith.constant 0 : index
    %c0_1 = arith.constant 0 : index
    %0 = vector.load %arg1[%c0, %c0_0, %c0_1] : memref<1x8x8xf32, #tpu.memory_space<vmem>>, vector<1x8x8xf32>
    %1 = vector.shape_cast %0 : vector<1x8x8xf32> to vector<8x8xf32>
    %cst = arith.constant dense<0.000000e+00> : vector<8x8xf32>
    %2 = tpu.matmul %1, %1, %cst {dimension_numbers = #tpu.dot_dimension_numbers<[1], [1], [0], [0], [0, 0, 1, 0], [], []>} : vector<8x8xf32>, vector<8x8xf32>, vector<8x8xf32> -> vector<8x8xf32>
    %cst_2 = arith.constant 0.353553385 : f32
    %3 = vector.broadcast %cst_2 : f32 to vector<8x8xf32>
    %4 = arith.mulf %2, %3 : vector<8x8xf32>
    %cst_3 = arith.constant dense<0xFF800000> : vector<8xf32>
    %5 = vector.multi_reduction <maximumf>, %4, %cst_3 [1] : vector<8x8xf32> to vector<8xf32>
    %6 = vector.shape_cast %5 : vector<8xf32> to vector<8x1xf32>
    %7 = vector.broadcast %6 : vector<8x1xf32> to vector<8x8xf32>
    %8 = arith.subf %4, %7 : vector<8x8xf32>
    %9 = math.exp %8 : vector<8x8xf32>
    %cst_4 = arith.constant dense<0.000000e+00> : vector<8xf32>
    %10 = vector.multi_reduction <add>, %9, %cst_4 [1] : vector<8x8xf32> to vector<8xf32>
    %11 = vector.shape_cast %10 : vector<8xf32> to vector<8x1xf32>
    %12 = tpu.reciprocal %11 : vector<8x1xf32> -> vector<8x1xf32>
    %13 = vector.broadcast %12 : vector<8x1xf32> to vector<8x8xf32>
    %14 = arith.mulf %9, %13 : vector<8x8xf32>
    %cst_5 = arith.constant dense<0.000000e+00> : vector<8x8xf32>
    %15 = tpu.matmul %14, %1, %cst_5 {dimension_numbers = #tpu.dot_dimension_numbers<[1], [0], [0], [1], [0, 0, 1, 1], [], []>} : vector<8x8xf32>, vector<8x8xf32>, vector<8x8xf32> -> vector<8x8xf32>
    %c0_6 = arith.constant 0 : index
    %c0_7 = arith.constant 0 : index
    %c0_8 = arith.constant 0 : index
    %16 = vector.load %arg2[%c0_6, %c0_7, %c0_8] : memref<1x8x8xf32, #tpu.memory_space<vmem>>, vector<1x8x8xf32>
    %17 = vector.shape_cast %16 : vector<1x8x8xf32> to vector<8x8xf32>
    %18 = vector.shape_cast %15 : vector<8x8xf32> to vector<1x8x8xf32>
    tpu.vector_store %arg2[%c0_6, %c0_7, %c0_8], %18 {strides = array<i32>} : memref<1x8x8xf32, #tpu.memory_space<vmem>>, vector<1x8x8xf32>,
    return
  }
  func.func @transform_0(%arg0: i32) -> (i32, i32, i32) {
    %c0_i32 = arith.constant 0 : i32
    %c0_i32_0 = arith.constant 0 : i32
    %c0_i32_1 = arith.constant 0 : i32
    return %arg0, %c0_i32, %c0_i32_0 : i32, i32, i32
  }
  func.func @transform_1(%arg0: i32) -> (i32, i32, i32) {
    %c0_i32 = arith.constant 0 : i32
    %c0_i32_0 = arith.constant 0 : i32
    %c0_i32_1 = arith.constant 0 : i32
    return %arg0, %c0_i32, %c0_i32_0 : i32, i32, i32
  }
}

module attributes {stable_mosaic.version = 11 : i64} {
  func.func @_sa_out_ln_qkproj_kernel(%arg0: i32, %arg1: memref<16x32xf32, #tpu.memory_space<vmem>>, %arg2: memref<16x32xf32, #tpu.memory_space<vmem>>, %arg3: memref<16x32xf32, #tpu.memory_space<vmem>>, %arg4: memref<32x32xf32, #tpu.memory_space<vmem>>, %arg5: memref<1x32xf32, #tpu.memory_space<vmem>>, %arg6: memref<1x32xf32, #tpu.memory_space<vmem>>, %arg7: memref<1x32xf32, #tpu.memory_space<vmem>>, %arg8: memref<32x32xf32, #tpu.memory_space<vmem>>, %arg9: memref<1x32xf32, #tpu.memory_space<vmem>>, %arg10: memref<16x32xf32, #tpu.memory_space<vmem>>, %arg11: memref<16x32xf32, #tpu.memory_space<vmem>>, %arg12: memref<16x32xf32, #tpu.memory_space<vmem>>) attributes {dimension_semantics = [#tpu.dimension_semantics<parallel>], iteration_bounds = array<i64: 1>, scalar_prefetch = 0 : i64, scratch_operands = 0 : i64, tpu.core_type = #tpu.core_type<tc>, window_params = [{transform_indices = @transform_0, window_bounds = array<i64: 16, 32>}, {transform_indices = @transform_1, window_bounds = array<i64: 16, 32>}, {transform_indices = @transform_2, window_bounds = array<i64: 16, 32>}, {pipeline_mode = #tpu.pipeline_mode<synchronous>, transform_indices = @transform_3, window_bounds = array<i64: 32, 32>}, {pipeline_mode = #tpu.pipeline_mode<synchronous>, transform_indices = @transform_4, window_bounds = array<i64: 1, 32>}, {pipeline_mode = #tpu.pipeline_mode<synchronous>, transform_indices = @transform_5, window_bounds = array<i64: 1, 32>}, {pipeline_mode = #tpu.pipeline_mode<synchronous>, transform_indices = @transform_6, window_bounds = array<i64: 1, 32>}, {pipeline_mode = #tpu.pipeline_mode<synchronous>, transform_indices = @transform_7, window_bounds = array<i64: 32, 32>}, {pipeline_mode = #tpu.pipeline_mode<synchronous>, transform_indices = @transform_8, window_bounds = array<i64: 1, 32>}, {transform_indices = @transform_9, window_bounds = array<i64: 16, 32>}, {transform_indices = @transform_10, window_bounds = array<i64: 16, 32>}, {transform_indices = @transform_11, window_bounds = array<i64: 16, 32>}]} {
    %c0 = arith.constant 0 : index
    %c0_0 = arith.constant 0 : index
    %0 = vector.load %arg1[%c0, %c0_0] : memref<16x32xf32, #tpu.memory_space<vmem>>, vector<16x32xf32>
    %c0_1 = arith.constant 0 : index
    %c0_2 = arith.constant 0 : index
    %1 = vector.load %arg4[%c0_1, %c0_2] : memref<32x32xf32, #tpu.memory_space<vmem>>, vector<32x32xf32>
    %cst = arith.constant dense<0.000000e+00> : vector<16x32xf32>
    %2 = tpu.matmul %0, %1, %cst {dimension_numbers = #tpu.dot_dimension_numbers<[1], [0], [0], [1], [0, 0, 1, 1], [], []>} : vector<16x32xf32>, vector<32x32xf32>, vector<16x32xf32> -> vector<16x32xf32>
    %c0_3 = arith.constant 0 : index
    %c0_4 = arith.constant 0 : index
    %3 = vector.load %arg5[%c0_3, %c0_4] : memref<1x32xf32, #tpu.memory_space<vmem>>, vector<1x32xf32>
    %4 = vector.broadcast %3 : vector<1x32xf32> to vector<16x32xf32>
    %5 = arith.addf %2, %4 : vector<16x32xf32>
    %c0_5 = arith.constant 0 : index
    %c0_6 = arith.constant 0 : index
    %6 = vector.load %arg2[%c0_5, %c0_6] : memref<16x32xf32, #tpu.memory_space<vmem>>, vector<16x32xf32>
    %7 = arith.addf %6, %5 : vector<16x32xf32>
    %c0_7 = arith.constant 0 : index
    %c0_8 = arith.constant 0 : index
    %8 = vector.load %arg6[%c0_7, %c0_8] : memref<1x32xf32, #tpu.memory_space<vmem>>, vector<1x32xf32>
    %c0_9 = arith.constant 0 : index
    %c0_10 = arith.constant 0 : index
    %9 = vector.load %arg7[%c0_9, %c0_10] : memref<1x32xf32, #tpu.memory_space<vmem>>, vector<1x32xf32>
    %cst_11 = arith.constant dense<0.000000e+00> : vector<16xf32>
    %10 = vector.multi_reduction <add>, %7, %cst_11 [1] : vector<16x32xf32> to vector<16xf32>
    %11 = vector.shape_cast %10 : vector<16xf32> to vector<16x1xf32>
    %cst_12 = arith.constant 3.200000e+01 : f32
    %12 = vector.broadcast %cst_12 : f32 to vector<16x1xf32>
    %13 = arith.divf %11, %12 : vector<16x1xf32>
    %14 = vector.broadcast %13 : vector<16x1xf32> to vector<16x32xf32>
    %15 = arith.subf %7, %14 : vector<16x32xf32>
    %16 = arith.mulf %15, %15 : vector<16x32xf32>
    %cst_13 = arith.constant dense<0.000000e+00> : vector<16xf32>
    %17 = vector.multi_reduction <add>, %16, %cst_13 [1] : vector<16x32xf32> to vector<16xf32>
    %18 = vector.shape_cast %17 : vector<16xf32> to vector<16x1xf32>
    %cst_14 = arith.constant 3.200000e+01 : f32
    %19 = vector.broadcast %cst_14 : f32 to vector<16x1xf32>
    %20 = arith.divf %18, %19 : vector<16x1xf32>
    %21 = vector.broadcast %13 : vector<16x1xf32> to vector<16x32xf32>
    %22 = arith.subf %7, %21 : vector<16x32xf32>
    %cst_15 = arith.constant 9.99999974E-6 : f32
    %23 = vector.broadcast %cst_15 : f32 to vector<16x1xf32>
    %24 = arith.addf %20, %23 : vector<16x1xf32>
    %25 = math.rsqrt %24 : vector<16x1xf32>
    %26 = vector.broadcast %25 : vector<16x1xf32> to vector<16x32xf32>
    %27 = arith.mulf %22, %26 : vector<16x32xf32>
    %28 = vector.broadcast %8 : vector<1x32xf32> to vector<16x32xf32>
    %29 = arith.mulf %27, %28 : vector<16x32xf32>
    %30 = vector.broadcast %9 : vector<1x32xf32> to vector<16x32xf32>
    %31 = arith.addf %29, %30 : vector<16x32xf32>
    %c0_16 = arith.constant 0 : index
    %c0_17 = arith.constant 0 : index
    %32 = vector.load %arg10[%c0_16, %c0_17] : memref<16x32xf32, #tpu.memory_space<vmem>>, vector<16x32xf32>
    tpu.vector_store %arg10[%c0_16, %c0_17], %31 {strides = array<i32>} : memref<16x32xf32, #tpu.memory_space<vmem>>, vector<16x32xf32>,
    %c0_18 = arith.constant 0 : index
    %c0_19 = arith.constant 0 : index
    %33 = vector.load %arg8[%c0_18, %c0_19] : memref<32x32xf32, #tpu.memory_space<vmem>>, vector<32x32xf32>
    %cst_20 = arith.constant dense<0.000000e+00> : vector<16x32xf32>
    %34 = tpu.matmul %31, %33, %cst_20 {dimension_numbers = #tpu.dot_dimension_numbers<[1], [0], [0], [1], [0, 0, 1, 1], [], []>} : vector<16x32xf32>, vector<32x32xf32>, vector<16x32xf32> -> vector<16x32xf32>
    %c0_21 = arith.constant 0 : index
    %c0_22 = arith.constant 0 : index
    %35 = vector.load %arg9[%c0_21, %c0_22] : memref<1x32xf32, #tpu.memory_space<vmem>>, vector<1x32xf32>
    %36 = vector.broadcast %35 : vector<1x32xf32> to vector<16x32xf32>
    %37 = arith.addf %34, %36 : vector<16x32xf32>
    %c0_23 = arith.constant 0 : index
    %c0_24 = arith.constant 0 : index
    %38 = vector.load %arg11[%c0_23, %c0_24] : memref<16x32xf32, #tpu.memory_space<vmem>>, vector<16x32xf32>
    tpu.vector_store %arg11[%c0_23, %c0_24], %37 {strides = array<i32>} : memref<16x32xf32, #tpu.memory_space<vmem>>, vector<16x32xf32>,
    %c0_25 = arith.constant 0 : index
    %c0_26 = arith.constant 0 : index
    %39 = vector.load %arg3[%c0_25, %c0_26] : memref<16x32xf32, #tpu.memory_space<vmem>>, vector<16x32xf32>
    %c0_27 = arith.constant 0 : index
    %c0_28 = arith.constant 0 : index
    %40 = vector.load %arg8[%c0_27, %c0_28] : memref<32x32xf32, #tpu.memory_space<vmem>>, vector<32x32xf32>
    %cst_29 = arith.constant dense<0.000000e+00> : vector<16x32xf32>
    %41 = tpu.matmul %39, %40, %cst_29 {dimension_numbers = #tpu.dot_dimension_numbers<[1], [0], [0], [1], [0, 0, 1, 1], [], []>} : vector<16x32xf32>, vector<32x32xf32>, vector<16x32xf32> -> vector<16x32xf32>
    %c0_30 = arith.constant 0 : index
    %c0_31 = arith.constant 0 : index
    %42 = vector.load %arg9[%c0_30, %c0_31] : memref<1x32xf32, #tpu.memory_space<vmem>>, vector<1x32xf32>
    %43 = vector.broadcast %42 : vector<1x32xf32> to vector<16x32xf32>
    %44 = arith.addf %41, %43 : vector<16x32xf32>
    %c0_32 = arith.constant 0 : index
    %c0_33 = arith.constant 0 : index
    %45 = vector.load %arg12[%c0_32, %c0_33] : memref<16x32xf32, #tpu.memory_space<vmem>>, vector<16x32xf32>
    tpu.vector_store %arg12[%c0_32, %c0_33], %44 {strides = array<i32>} : memref<16x32xf32, #tpu.memory_space<vmem>>, vector<16x32xf32>,
    return
  }
  func.func @transform_0(%arg0: i32) -> (i32, i32) {
    %c0_i32 = arith.constant 0 : i32
    %c0_i32_0 = arith.constant 0 : i32
    return %arg0, %c0_i32 : i32, i32
  }
  func.func @transform_1(%arg0: i32) -> (i32, i32) {
    %c0_i32 = arith.constant 0 : i32
    %c0_i32_0 = arith.constant 0 : i32
    return %arg0, %c0_i32 : i32, i32
  }
  func.func @transform_2(%arg0: i32) -> (i32, i32) {
    %c0_i32 = arith.constant 0 : i32
    %c0_i32_0 = arith.constant 0 : i32
    return %arg0, %c0_i32 : i32, i32
  }
  func.func @transform_3(%arg0: i32) -> (i32, i32) {
    %c0_i32 = arith.constant 0 : i32
    %c0_i32_0 = arith.constant 0 : i32
    %c0_i32_1 = arith.constant 0 : i32
    return %c0_i32, %c0_i32_0 : i32, i32
  }
  func.func @transform_4(%arg0: i32) -> (i32, i32) {
    %c0_i32 = arith.constant 0 : i32
    %c0_i32_0 = arith.constant 0 : i32
    %c0_i32_1 = arith.constant 0 : i32
    return %c0_i32, %c0_i32_0 : i32, i32
  }
  func.func @transform_5(%arg0: i32) -> (i32, i32) {
    %c0_i32 = arith.constant 0 : i32
    %c0_i32_0 = arith.constant 0 : i32
    %c0_i32_1 = arith.constant 0 : i32
    return %c0_i32, %c0_i32_0 : i32, i32
  }
  func.func @transform_6(%arg0: i32) -> (i32, i32) {
    %c0_i32 = arith.constant 0 : i32
    %c0_i32_0 = arith.constant 0 : i32
    %c0_i32_1 = arith.constant 0 : i32
    return %c0_i32, %c0_i32_0 : i32, i32
  }
  func.func @transform_7(%arg0: i32) -> (i32, i32) {
    %c0_i32 = arith.constant 0 : i32
    %c0_i32_0 = arith.constant 0 : i32
    %c0_i32_1 = arith.constant 0 : i32
    return %c0_i32, %c0_i32_0 : i32, i32
  }
  func.func @transform_8(%arg0: i32) -> (i32, i32) {
    %c0_i32 = arith.constant 0 : i32
    %c0_i32_0 = arith.constant 0 : i32
    %c0_i32_1 = arith.constant 0 : i32
    return %c0_i32, %c0_i32_0 : i32, i32
  }
  func.func @transform_9(%arg0: i32) -> (i32, i32) {
    %c0_i32 = arith.constant 0 : i32
    %c0_i32_0 = arith.constant 0 : i32
    return %arg0, %c0_i32 : i32, i32
  }
  func.func @transform_10(%arg0: i32) -> (i32, i32) {
    %c0_i32 = arith.constant 0 : i32
    %c0_i32_0 = arith.constant 0 : i32
    return %arg0, %c0_i32 : i32, i32
  }
  func.func @transform_11(%arg0: i32) -> (i32, i32) {
    %c0_i32 = arith.constant 0 : i32
    %c0_i32_0 = arith.constant 0 : i32
    return %arg0, %c0_i32 : i32, i32
  }
}

module attributes {stable_mosaic.version = 11 : i64} {
  func.func @_cross_attn_kernel(%arg0: i32, %arg1: memref<1x8x8xf32, #tpu.memory_space<vmem>>, %arg2: memref<1x8x8xf32, #tpu.memory_space<vmem>>, %arg3: memref<1x8x8xf32, #tpu.memory_space<vmem>>) attributes {dimension_semantics = [#tpu.dimension_semantics<parallel>], iteration_bounds = array<i64: 8>, scalar_prefetch = 0 : i64, scratch_operands = 0 : i64, tpu.core_type = #tpu.core_type<tc>, window_params = [{transform_indices = @transform_0, window_bounds = array<i64: 1, 8, 8>}, {transform_indices = @transform_1, window_bounds = array<i64: 1, 8, 8>}, {transform_indices = @transform_2, window_bounds = array<i64: 1, 8, 8>}]} {
    %c0 = arith.constant 0 : index
    %c0_0 = arith.constant 0 : index
    %c0_1 = arith.constant 0 : index
    %0 = vector.load %arg1[%c0, %c0_0, %c0_1] : memref<1x8x8xf32, #tpu.memory_space<vmem>>, vector<1x8x8xf32>
    %1 = vector.shape_cast %0 : vector<1x8x8xf32> to vector<8x8xf32>
    %c0_2 = arith.constant 0 : index
    %c0_3 = arith.constant 0 : index
    %c0_4 = arith.constant 0 : index
    %2 = vector.load %arg2[%c0_2, %c0_3, %c0_4] : memref<1x8x8xf32, #tpu.memory_space<vmem>>, vector<1x8x8xf32>
    %3 = vector.shape_cast %2 : vector<1x8x8xf32> to vector<8x8xf32>
    %cst = arith.constant dense<0.000000e+00> : vector<8x8xf32>
    %4 = tpu.matmul %1, %3, %cst {dimension_numbers = #tpu.dot_dimension_numbers<[1], [1], [0], [0], [0, 0, 1, 0], [], []>} : vector<8x8xf32>, vector<8x8xf32>, vector<8x8xf32> -> vector<8x8xf32>
    %cst_5 = arith.constant 0.353553385 : f32
    %5 = vector.broadcast %cst_5 : f32 to vector<8x8xf32>
    %6 = arith.mulf %4, %5 : vector<8x8xf32>
    %cst_6 = arith.constant dense<0xFF800000> : vector<8xf32>
    %7 = vector.multi_reduction <maximumf>, %6, %cst_6 [1] : vector<8x8xf32> to vector<8xf32>
    %8 = vector.shape_cast %7 : vector<8xf32> to vector<8x1xf32>
    %9 = vector.broadcast %8 : vector<8x1xf32> to vector<8x8xf32>
    %10 = arith.subf %6, %9 : vector<8x8xf32>
    %11 = math.exp %10 : vector<8x8xf32>
    %cst_7 = arith.constant dense<0.000000e+00> : vector<8xf32>
    %12 = vector.multi_reduction <add>, %11, %cst_7 [1] : vector<8x8xf32> to vector<8xf32>
    %13 = vector.shape_cast %12 : vector<8xf32> to vector<8x1xf32>
    %14 = tpu.reciprocal %13 : vector<8x1xf32> -> vector<8x1xf32>
    %15 = vector.broadcast %14 : vector<8x1xf32> to vector<8x8xf32>
    %16 = arith.mulf %11, %15 : vector<8x8xf32>
    %cst_8 = arith.constant dense<0.000000e+00> : vector<8x8xf32>
    %17 = tpu.matmul %16, %3, %cst_8 {dimension_numbers = #tpu.dot_dimension_numbers<[1], [0], [0], [1], [0, 0, 1, 1], [], []>} : vector<8x8xf32>, vector<8x8xf32>, vector<8x8xf32> -> vector<8x8xf32>
    %c0_9 = arith.constant 0 : index
    %c0_10 = arith.constant 0 : index
    %c0_11 = arith.constant 0 : index
    %18 = vector.load %arg3[%c0_9, %c0_10, %c0_11] : memref<1x8x8xf32, #tpu.memory_space<vmem>>, vector<1x8x8xf32>
    %19 = vector.shape_cast %18 : vector<1x8x8xf32> to vector<8x8xf32>
    %20 = vector.shape_cast %17 : vector<8x8xf32> to vector<1x8x8xf32>
    tpu.vector_store %arg3[%c0_9, %c0_10, %c0_11], %20 {strides = array<i32>} : memref<1x8x8xf32, #tpu.memory_space<vmem>>, vector<1x8x8xf32>,
    return
  }
  func.func @transform_0(%arg0: i32) -> (i32, i32, i32) {
    %c0_i32 = arith.constant 0 : i32
    %c0_i32_0 = arith.constant 0 : i32
    %c0_i32_1 = arith.constant 0 : i32
    return %arg0, %c0_i32, %c0_i32_0 : i32, i32, i32
  }
  func.func @transform_1(%arg0: i32) -> (i32, i32, i32) {
    %c0_i32 = arith.constant 0 : i32
    %c0_i32_0 = arith.constant 0 : i32
    %c0_i32_1 = arith.constant 0 : i32
    return %arg0, %c0_i32, %c0_i32_0 : i32, i32, i32
  }
  func.func @transform_2(%arg0: i32) -> (i32, i32, i32) {
    %c0_i32 = arith.constant 0 : i32
    %c0_i32_0 = arith.constant 0 : i32
    %c0_i32_1 = arith.constant 0 : i32
    return %arg0, %c0_i32, %c0_i32_0 : i32, i32, i32
  }
}

module attributes {stable_mosaic.version = 11 : i64} {
  func.func @_ca_out_ln_ffn_ln_kernel(%arg0: i32, %arg1: i32, %arg2: memref<16x32xf32, #tpu.memory_space<vmem>>, %arg3: memref<16x32xf32, #tpu.memory_space<vmem>>, %arg4: memref<32x32xf32, #tpu.memory_space<vmem>>, %arg5: memref<1x32xf32, #tpu.memory_space<vmem>>, %arg6: memref<1x32xf32, #tpu.memory_space<vmem>>, %arg7: memref<1x32xf32, #tpu.memory_space<vmem>>, %arg8: memref<32x128xf32, #tpu.memory_space<vmem>>, %arg9: memref<1x128xf32, #tpu.memory_space<vmem>>, %arg10: memref<128x32xf32, #tpu.memory_space<vmem>>, %arg11: memref<1x32xf32, #tpu.memory_space<vmem>>, %arg12: memref<1x32xf32, #tpu.memory_space<vmem>>, %arg13: memref<1x32xf32, #tpu.memory_space<vmem>>, %arg14: memref<16x32xf32, #tpu.memory_space<vmem>>, %arg15: memref<16x32xf32, #tpu.memory_space<vmem>>, %arg16: memref<16x32xf32, #tpu.memory_space<vmem>>) attributes {dimension_semantics = [#tpu.dimension_semantics<parallel>, #tpu.dimension_semantics<arbitrary>], iteration_bounds = array<i64: 1, 2>, scalar_prefetch = 0 : i64, scratch_operands = 2 : i64, tpu.core_type = #tpu.core_type<tc>, window_params = [{transform_indices = @transform_0, window_bounds = array<i64: 16, 32>}, {transform_indices = @transform_1, window_bounds = array<i64: 16, 32>}, {pipeline_mode = #tpu.pipeline_mode<synchronous>, transform_indices = @transform_2, window_bounds = array<i64: 32, 32>}, {pipeline_mode = #tpu.pipeline_mode<synchronous>, transform_indices = @transform_3, window_bounds = array<i64: 1, 32>}, {pipeline_mode = #tpu.pipeline_mode<synchronous>, transform_indices = @transform_4, window_bounds = array<i64: 1, 32>}, {pipeline_mode = #tpu.pipeline_mode<synchronous>, transform_indices = @transform_5, window_bounds = array<i64: 1, 32>}, {transform_indices = @transform_6, window_bounds = array<i64: 32, 128>}, {transform_indices = @transform_7, window_bounds = array<i64: 1, 128>}, {transform_indices = @transform_8, window_bounds = array<i64: 128, 32>}, {pipeline_mode = #tpu.pipeline_mode<synchronous>, transform_indices = @transform_9, window_bounds = array<i64: 1, 32>}, {pipeline_mode = #tpu.pipeline_mode<synchronous>, transform_indices = @transform_10, window_bounds = array<i64: 1, 32>}, {pipeline_mode = #tpu.pipeline_mode<synchronous>, transform_indices = @transform_11, window_bounds = array<i64: 1, 32>}, {transform_indices = @transform_12, window_bounds = array<i64: 16, 32>}]} {
    %c0_i32 = arith.constant 0 : i32
    %0 = arith.cmpi eq, %arg1, %c0_i32 : i32
    %1 = arith.extui %0 : i1 to i32
    %c0_i32_0 = arith.constant 0 : i32
    %2 = arith.cmpi ne, %1, %c0_i32_0 : i32
    scf.if %2 {
      %c0_15 = arith.constant 0 : index
      %c0_16 = arith.constant 0 : index
      %19 = vector.load %arg2[%c0_15, %c0_16] : memref<16x32xf32, #tpu.memory_space<vmem>>, vector<16x32xf32>
      %c0_17 = arith.constant 0 : index
      %c0_18 = arith.constant 0 : index
      %20 = vector.load %arg4[%c0_17, %c0_18] : memref<32x32xf32, #tpu.memory_space<vmem>>, vector<32x32xf32>
      %cst_19 = arith.constant dense<0.000000e+00> : vector<16x32xf32>
      %21 = tpu.matmul %19, %20, %cst_19 {dimension_numbers = #tpu.dot_dimension_numbers<[1], [0], [0], [1], [0, 0, 1, 1], [], []>} : vector<16x32xf32>, vector<32x32xf32>, vector<16x32xf32> -> vector<16x32xf32>
      %c0_20 = arith.constant 0 : index
      %c0_21 = arith.constant 0 : index
      %22 = vector.load %arg5[%c0_20, %c0_21] : memref<1x32xf32, #tpu.memory_space<vmem>>, vector<1x32xf32>
      %23 = vector.broadcast %22 : vector<1x32xf32> to vector<16x32xf32>
      %24 = arith.addf %21, %23 : vector<16x32xf32>
      %c0_22 = arith.constant 0 : index
      %c0_23 = arith.constant 0 : index
      %25 = vector.load %arg3[%c0_22, %c0_23] : memref<16x32xf32, #tpu.memory_space<vmem>>, vector<16x32xf32>
      %26 = arith.addf %25, %24 : vector<16x32xf32>
      %c0_24 = arith.constant 0 : index
      %c0_25 = arith.constant 0 : index
      %27 = vector.load %arg6[%c0_24, %c0_25] : memref<1x32xf32, #tpu.memory_space<vmem>>, vector<1x32xf32>
      %c0_26 = arith.constant 0 : index
      %c0_27 = arith.constant 0 : index
      %28 = vector.load %arg7[%c0_26, %c0_27] : memref<1x32xf32, #tpu.memory_space<vmem>>, vector<1x32xf32>
      %cst_28 = arith.constant dense<0.000000e+00> : vector<16xf32>
      %29 = vector.multi_reduction <add>, %26, %cst_28 [1] : vector<16x32xf32> to vector<16xf32>
      %30 = vector.shape_cast %29 : vector<16xf32> to vector<16x1xf32>
      %cst_29 = arith.constant 3.200000e+01 : f32
      %31 = vector.broadcast %cst_29 : f32 to vector<16x1xf32>
      %32 = arith.divf %30, %31 : vector<16x1xf32>
      %33 = vector.broadcast %32 : vector<16x1xf32> to vector<16x32xf32>
      %34 = arith.subf %26, %33 : vector<16x32xf32>
      %35 = arith.mulf %34, %34 : vector<16x32xf32>
      %cst_30 = arith.constant dense<0.000000e+00> : vector<16xf32>
      %36 = vector.multi_reduction <add>, %35, %cst_30 [1] : vector<16x32xf32> to vector<16xf32>
      %37 = vector.shape_cast %36 : vector<16xf32> to vector<16x1xf32>
      %cst_31 = arith.constant 3.200000e+01 : f32
      %38 = vector.broadcast %cst_31 : f32 to vector<16x1xf32>
      %39 = arith.divf %37, %38 : vector<16x1xf32>
      %40 = vector.broadcast %32 : vector<16x1xf32> to vector<16x32xf32>
      %41 = arith.subf %26, %40 : vector<16x32xf32>
      %cst_32 = arith.constant 9.99999974E-6 : f32
      %42 = vector.broadcast %cst_32 : f32 to vector<16x1xf32>
      %43 = arith.addf %39, %42 : vector<16x1xf32>
      %44 = math.rsqrt %43 : vector<16x1xf32>
      %45 = vector.broadcast %44 : vector<16x1xf32> to vector<16x32xf32>
      %46 = arith.mulf %41, %45 : vector<16x32xf32>
      %47 = vector.broadcast %27 : vector<1x32xf32> to vector<16x32xf32>
      %48 = arith.mulf %46, %47 : vector<16x32xf32>
      %49 = vector.broadcast %28 : vector<1x32xf32> to vector<16x32xf32>
      %50 = arith.addf %48, %49 : vector<16x32xf32>
      %c0_33 = arith.constant 0 : index
      %c0_34 = arith.constant 0 : index
      %51 = vector.load %arg15[%c0_33, %c0_34] : memref<16x32xf32, #tpu.memory_space<vmem>>, vector<16x32xf32>
      tpu.vector_store %arg15[%c0_33, %c0_34], %50 {strides = array<i32>} : memref<16x32xf32, #tpu.memory_space<vmem>>, vector<16x32xf32>,
      %cst_35 = arith.constant 0.000000e+00 : f32
      %52 = vector.broadcast %cst_35 : f32 to vector<16x32xf32>
      %c0_36 = arith.constant 0 : index
      %c0_37 = arith.constant 0 : index
      %53 = vector.load %arg16[%c0_36, %c0_37] : memref<16x32xf32, #tpu.memory_space<vmem>>, vector<16x32xf32>
      tpu.vector_store %arg16[%c0_36, %c0_37], %52 {strides = array<i32>} : memref<16x32xf32, #tpu.memory_space<vmem>>, vector<16x32xf32>,
    } else {
    }
    %c0 = arith.constant 0 : index
    %c0_1 = arith.constant 0 : index
    %3 = vector.load %arg15[%c0, %c0_1] : memref<16x32xf32, #tpu.memory_space<vmem>>, vector<16x32xf32>
    %c0_2 = arith.constant 0 : index
    %c0_3 = arith.constant 0 : index
    %4 = vector.load %arg8[%c0_2, %c0_3] : memref<32x128xf32, #tpu.memory_space<vmem>>, vector<32x128xf32>
    %cst = arith.constant dense<0.000000e+00> : vector<16x128xf32>
    %5 = tpu.matmul %3, %4, %cst {dimension_numbers = #tpu.dot_dimension_numbers<[1], [0], [0], [1], [0, 0, 1, 1], [], []>} : vector<16x32xf32>, vector<32x128xf32>, vector<16x128xf32> -> vector<16x128xf32>
    %c0_4 = arith.constant 0 : index
    %c0_5 = arith.constant 0 : index
    %6 = vector.load %arg9[%c0_4, %c0_5] : memref<1x128xf32, #tpu.memory_space<vmem>>, vector<1x128xf32>
    %7 = vector.broadcast %6 : vector<1x128xf32> to vector<16x128xf32>
    %8 = arith.addf %5, %7 : vector<16x128xf32>
    %cst_6 = arith.constant 0.000000e+00 : f32
    %9 = vector.broadcast %cst_6 : f32 to vector<16x128xf32>
    %10 = arith.maximumf %8, %9 : vector<16x128xf32>
    %c0_7 = arith.constant 0 : index
    %c0_8 = arith.constant 0 : index
    %11 = vector.load %arg16[%c0_7, %c0_8] : memref<16x32xf32, #tpu.memory_space<vmem>>, vector<16x32xf32>
    %c0_9 = arith.constant 0 : index
    %c0_10 = arith.constant 0 : index
    %12 = vector.load %arg10[%c0_9, %c0_10] : memref<128x32xf32, #tpu.memory_space<vmem>>, vector<128x32xf32>
    %cst_11 = arith.constant dense<0.000000e+00> : vector<16x32xf32>
    %13 = tpu.matmul %10, %12, %cst_11 {dimension_numbers = #tpu.dot_dimension_numbers<[1], [0], [0], [1], [0, 0, 1, 1], [], []>} : vector<16x128xf32>, vector<128x32xf32>, vector<16x32xf32> -> vector<16x32xf32>
    %14 = arith.addf %11, %13 : vector<16x32xf32>
    %c0_12 = arith.constant 0 : index
    %c0_13 = arith.constant 0 : index
    %15 = vector.load %arg16[%c0_12, %c0_13] : memref<16x32xf32, #tpu.memory_space<vmem>>, vector<16x32xf32>
    tpu.vector_store %arg16[%c0_12, %c0_13], %14 {strides = array<i32>} : memref<16x32xf32, #tpu.memory_space<vmem>>, vector<16x32xf32>,
    %c1_i32 = arith.constant 1 : i32
    %16 = arith.cmpi eq, %arg1, %c1_i32 : i32
    %17 = arith.extui %16 : i1 to i32
    %c0_i32_14 = arith.constant 0 : i32
    %18 = arith.cmpi ne, %17, %c0_i32_14 : i32
    scf.if %18 {
      %c0_15 = arith.constant 0 : index
      %c0_16 = arith.constant 0 : index
      %19 = vector.load %arg15[%c0_15, %c0_16] : memref<16x32xf32, #tpu.memory_space<vmem>>, vector<16x32xf32>
      %c0_17 = arith.constant 0 : index
      %c0_18 = arith.constant 0 : index
      %20 = vector.load %arg16[%c0_17, %c0_18] : memref<16x32xf32, #tpu.memory_space<vmem>>, vector<16x32xf32>
      %21 = arith.addf %19, %20 : vector<16x32xf32>
      %c0_19 = arith.constant 0 : index
      %c0_20 = arith.constant 0 : index
      %22 = vector.load %arg11[%c0_19, %c0_20] : memref<1x32xf32, #tpu.memory_space<vmem>>, vector<1x32xf32>
      %23 = vector.broadcast %22 : vector<1x32xf32> to vector<16x32xf32>
      %24 = arith.addf %21, %23 : vector<16x32xf32>
      %c0_21 = arith.constant 0 : index
      %c0_22 = arith.constant 0 : index
      %25 = vector.load %arg12[%c0_21, %c0_22] : memref<1x32xf32, #tpu.memory_space<vmem>>, vector<1x32xf32>
      %c0_23 = arith.constant 0 : index
      %c0_24 = arith.constant 0 : index
      %26 = vector.load %arg13[%c0_23, %c0_24] : memref<1x32xf32, #tpu.memory_space<vmem>>, vector<1x32xf32>
      %cst_25 = arith.constant dense<0.000000e+00> : vector<16xf32>
      %27 = vector.multi_reduction <add>, %24, %cst_25 [1] : vector<16x32xf32> to vector<16xf32>
      %28 = vector.shape_cast %27 : vector<16xf32> to vector<16x1xf32>
      %cst_26 = arith.constant 3.200000e+01 : f32
      %29 = vector.broadcast %cst_26 : f32 to vector<16x1xf32>
      %30 = arith.divf %28, %29 : vector<16x1xf32>
      %31 = vector.broadcast %30 : vector<16x1xf32> to vector<16x32xf32>
      %32 = arith.subf %24, %31 : vector<16x32xf32>
      %33 = arith.mulf %32, %32 : vector<16x32xf32>
      %cst_27 = arith.constant dense<0.000000e+00> : vector<16xf32>
      %34 = vector.multi_reduction <add>, %33, %cst_27 [1] : vector<16x32xf32> to vector<16xf32>
      %35 = vector.shape_cast %34 : vector<16xf32> to vector<16x1xf32>
      %cst_28 = arith.constant 3.200000e+01 : f32
      %36 = vector.broadcast %cst_28 : f32 to vector<16x1xf32>
      %37 = arith.divf %35, %36 : vector<16x1xf32>
      %38 = vector.broadcast %30 : vector<16x1xf32> to vector<16x32xf32>
      %39 = arith.subf %24, %38 : vector<16x32xf32>
      %cst_29 = arith.constant 9.99999974E-6 : f32
      %40 = vector.broadcast %cst_29 : f32 to vector<16x1xf32>
      %41 = arith.addf %37, %40 : vector<16x1xf32>
      %42 = math.rsqrt %41 : vector<16x1xf32>
      %43 = vector.broadcast %42 : vector<16x1xf32> to vector<16x32xf32>
      %44 = arith.mulf %39, %43 : vector<16x32xf32>
      %45 = vector.broadcast %25 : vector<1x32xf32> to vector<16x32xf32>
      %46 = arith.mulf %44, %45 : vector<16x32xf32>
      %47 = vector.broadcast %26 : vector<1x32xf32> to vector<16x32xf32>
      %48 = arith.addf %46, %47 : vector<16x32xf32>
      %c0_30 = arith.constant 0 : index
      %c0_31 = arith.constant 0 : index
      %49 = vector.load %arg14[%c0_30, %c0_31] : memref<16x32xf32, #tpu.memory_space<vmem>>, vector<16x32xf32>
      tpu.vector_store %arg14[%c0_30, %c0_31], %48 {strides = array<i32>} : memref<16x32xf32, #tpu.memory_space<vmem>>, vector<16x32xf32>,
    } else {
    }
    return
  }
  func.func @transform_0(%arg0: i32, %arg1: i32) -> (i32, i32) {
    %c0_i32 = arith.constant 0 : i32
    %c0_i32_0 = arith.constant 0 : i32
    return %arg0, %c0_i32 : i32, i32
  }
  func.func @transform_1(%arg0: i32, %arg1: i32) -> (i32, i32) {
    %c0_i32 = arith.constant 0 : i32
    %c0_i32_0 = arith.constant 0 : i32
    return %arg0, %c0_i32 : i32, i32
  }
  func.func @transform_2(%arg0: i32, %arg1: i32) -> (i32, i32) {
    %c0_i32 = arith.constant 0 : i32
    %c0_i32_0 = arith.constant 0 : i32
    %c0_i32_1 = arith.constant 0 : i32
    return %c0_i32, %c0_i32_0 : i32, i32
  }
  func.func @transform_3(%arg0: i32, %arg1: i32) -> (i32, i32) {
    %c0_i32 = arith.constant 0 : i32
    %c0_i32_0 = arith.constant 0 : i32
    %c0_i32_1 = arith.constant 0 : i32
    return %c0_i32, %c0_i32_0 : i32, i32
  }
  func.func @transform_4(%arg0: i32, %arg1: i32) -> (i32, i32) {
    %c0_i32 = arith.constant 0 : i32
    %c0_i32_0 = arith.constant 0 : i32
    %c0_i32_1 = arith.constant 0 : i32
    return %c0_i32, %c0_i32_0 : i32, i32
  }
  func.func @transform_5(%arg0: i32, %arg1: i32) -> (i32, i32) {
    %c0_i32 = arith.constant 0 : i32
    %c0_i32_0 = arith.constant 0 : i32
    %c0_i32_1 = arith.constant 0 : i32
    return %c0_i32, %c0_i32_0 : i32, i32
  }
  func.func @transform_6(%arg0: i32, %arg1: i32) -> (i32, i32) {
    %c0_i32 = arith.constant 0 : i32
    %c0_i32_0 = arith.constant 0 : i32
    return %c0_i32, %arg1 : i32, i32
  }
  func.func @transform_7(%arg0: i32, %arg1: i32) -> (i32, i32) {
    %c0_i32 = arith.constant 0 : i32
    %c0_i32_0 = arith.constant 0 : i32
    return %c0_i32, %arg1 : i32, i32
  }
  func.func @transform_8(%arg0: i32, %arg1: i32) -> (i32, i32) {
    %c0_i32 = arith.constant 0 : i32
    %c0_i32_0 = arith.constant 0 : i32
    return %arg1, %c0_i32 : i32, i32
  }
  func.func @transform_9(%arg0: i32, %arg1: i32) -> (i32, i32) {
    %c0_i32 = arith.constant 0 : i32
    %c0_i32_0 = arith.constant 0 : i32
    %c0_i32_1 = arith.constant 0 : i32
    return %c0_i32, %c0_i32_0 : i32, i32
  }
  func.func @transform_10(%arg0: i32, %arg1: i32) -> (i32, i32) {
    %c0_i32 = arith.constant 0 : i32
    %c0_i32_0 = arith.constant 0 : i32
    %c0_i32_1 = arith.constant 0 : i32
    return %c0_i32, %c0_i32_0 : i32, i32
  }
  func.func @transform_11(%arg0: i32, %arg1: i32) -> (i32, i32) {
    %c0_i32 = arith.constant 0 : i32
    %c0_i32_0 = arith.constant 0 : i32
    %c0_i32_1 = arith.constant 0 : i32
    return %c0_i32, %c0_i32_0 : i32, i32
  }
  func.func @transform_12(%arg0: i32, %arg1: i32) -> (i32, i32) {
    %c0_i32 = arith.constant 0 : i32
    %c0_i32_0 = arith.constant 0 : i32
    return %arg0, %c0_i32 : i32, i32
  }
}

module attributes {stable_mosaic.version = 11 : i64} {
  func.func @_proj_kernel(%arg0: i32, %arg1: memref<16x32xf32, #tpu.memory_space<vmem>>, %arg2: memref<32x32xf32, #tpu.memory_space<vmem>>, %arg3: memref<1x32xf32, #tpu.memory_space<vmem>>, %arg4: memref<16x32xf32, #tpu.memory_space<vmem>>) attributes {dimension_semantics = [#tpu.dimension_semantics<parallel>], iteration_bounds = array<i64: 1>, scalar_prefetch = 0 : i64, scratch_operands = 0 : i64, tpu.core_type = #tpu.core_type<tc>, window_params = [{transform_indices = @transform_0, window_bounds = array<i64: 16, 32>}, {pipeline_mode = #tpu.pipeline_mode<synchronous>, transform_indices = @transform_1, window_bounds = array<i64: 32, 32>}, {pipeline_mode = #tpu.pipeline_mode<synchronous>, transform_indices = @transform_2, window_bounds = array<i64: 1, 32>}, {transform_indices = @transform_3, window_bounds = array<i64: 16, 32>}]} {
    %c0 = arith.constant 0 : index
    %c0_0 = arith.constant 0 : index
    %0 = vector.load %arg1[%c0, %c0_0] : memref<16x32xf32, #tpu.memory_space<vmem>>, vector<16x32xf32>
    %c0_1 = arith.constant 0 : index
    %c0_2 = arith.constant 0 : index
    %1 = vector.load %arg2[%c0_1, %c0_2] : memref<32x32xf32, #tpu.memory_space<vmem>>, vector<32x32xf32>
    %cst = arith.constant dense<0.000000e+00> : vector<16x32xf32>
    %2 = tpu.matmul %0, %1, %cst {dimension_numbers = #tpu.dot_dimension_numbers<[1], [0], [0], [1], [0, 0, 1, 1], [], []>} : vector<16x32xf32>, vector<32x32xf32>, vector<16x32xf32> -> vector<16x32xf32>
    %c0_3 = arith.constant 0 : index
    %c0_4 = arith.constant 0 : index
    %3 = vector.load %arg3[%c0_3, %c0_4] : memref<1x32xf32, #tpu.memory_space<vmem>>, vector<1x32xf32>
    %4 = vector.broadcast %3 : vector<1x32xf32> to vector<16x32xf32>
    %5 = arith.addf %2, %4 : vector<16x32xf32>
    %c0_5 = arith.constant 0 : index
    %c0_6 = arith.constant 0 : index
    %6 = vector.load %arg4[%c0_5, %c0_6] : memref<16x32xf32, #tpu.memory_space<vmem>>, vector<16x32xf32>
    tpu.vector_store %arg4[%c0_5, %c0_6], %5 {strides = array<i32>} : memref<16x32xf32, #tpu.memory_space<vmem>>, vector<16x32xf32>,
    return
  }
  func.func @transform_0(%arg0: i32) -> (i32, i32) {
    %c0_i32 = arith.constant 0 : i32
    %c0_i32_0 = arith.constant 0 : i32
    return %arg0, %c0_i32 : i32, i32
  }
  func.func @transform_1(%arg0: i32) -> (i32, i32) {
    %c0_i32 = arith.constant 0 : i32
    %c0_i32_0 = arith.constant 0 : i32
    %c0_i32_1 = arith.constant 0 : i32
    return %c0_i32, %c0_i32_0 : i32, i32
  }
  func.func @transform_2(%arg0: i32) -> (i32, i32) {
    %c0_i32 = arith.constant 0 : i32
    %c0_i32_0 = arith.constant 0 : i32
    %c0_i32_1 = arith.constant 0 : i32
    return %c0_i32, %c0_i32_0 : i32, i32
  }
  func.func @transform_3(%arg0: i32) -> (i32, i32) {
    %c0_i32 = arith.constant 0 : i32
    %c0_i32_0 = arith.constant 0 : i32
    return %arg0, %c0_i32 : i32, i32
  }
}

module attributes {stable_mosaic.version = 11 : i64} {
  func.func @_ca_out_ln_ffn_ln_kernel(%arg0: i32, %arg1: i32, %arg2: memref<16x32xf32, #tpu.memory_space<vmem>>, %arg3: memref<16x32xf32, #tpu.memory_space<vmem>>, %arg4: memref<32x32xf32, #tpu.memory_space<vmem>>, %arg5: memref<1x32xf32, #tpu.memory_space<vmem>>, %arg6: memref<1x32xf32, #tpu.memory_space<vmem>>, %arg7: memref<1x32xf32, #tpu.memory_space<vmem>>, %arg8: memref<32x128xf32, #tpu.memory_space<vmem>>, %arg9: memref<1x128xf32, #tpu.memory_space<vmem>>, %arg10: memref<128x32xf32, #tpu.memory_space<vmem>>, %arg11: memref<1x32xf32, #tpu.memory_space<vmem>>, %arg12: memref<1x32xf32, #tpu.memory_space<vmem>>, %arg13: memref<1x32xf32, #tpu.memory_space<vmem>>, %arg14: memref<16x32xf32, #tpu.memory_space<vmem>>, %arg15: memref<16x32xf32, #tpu.memory_space<vmem>>, %arg16: memref<16x32xf32, #tpu.memory_space<vmem>>) attributes {dimension_semantics = [#tpu.dimension_semantics<parallel>, #tpu.dimension_semantics<arbitrary>], iteration_bounds = array<i64: 1, 2>, scalar_prefetch = 0 : i64, scratch_operands = 2 : i64, tpu.core_type = #tpu.core_type<tc>, window_params = [{transform_indices = @transform_0, window_bounds = array<i64: 16, 32>}, {transform_indices = @transform_1, window_bounds = array<i64: 16, 32>}, {pipeline_mode = #tpu.pipeline_mode<synchronous>, transform_indices = @transform_2, window_bounds = array<i64: 32, 32>}, {pipeline_mode = #tpu.pipeline_mode<synchronous>, transform_indices = @transform_3, window_bounds = array<i64: 1, 32>}, {pipeline_mode = #tpu.pipeline_mode<synchronous>, transform_indices = @transform_4, window_bounds = array<i64: 1, 32>}, {pipeline_mode = #tpu.pipeline_mode<synchronous>, transform_indices = @transform_5, window_bounds = array<i64: 1, 32>}, {transform_indices = @transform_6, window_bounds = array<i64: 32, 128>}, {transform_indices = @transform_7, window_bounds = array<i64: 1, 128>}, {transform_indices = @transform_8, window_bounds = array<i64: 128, 32>}, {pipeline_mode = #tpu.pipeline_mode<synchronous>, transform_indices = @transform_9, window_bounds = array<i64: 1, 32>}, {pipeline_mode = #tpu.pipeline_mode<synchronous>, transform_indices = @transform_10, window_bounds = array<i64: 1, 32>}, {pipeline_mode = #tpu.pipeline_mode<synchronous>, transform_indices = @transform_11, window_bounds = array<i64: 1, 32>}, {transform_indices = @transform_12, window_bounds = array<i64: 16, 32>}]} {
    %c0_i32 = arith.constant 0 : i32
    %0 = arith.cmpi eq, %arg1, %c0_i32 : i32
    %1 = arith.extui %0 : i1 to i32
    %c0_i32_0 = arith.constant 0 : i32
    %2 = arith.cmpi ne, %1, %c0_i32_0 : i32
    scf.if %2 {
      %c0_15 = arith.constant 0 : index
      %c0_16 = arith.constant 0 : index
      %19 = vector.load %arg2[%c0_15, %c0_16] : memref<16x32xf32, #tpu.memory_space<vmem>>, vector<16x32xf32>
      %c0_17 = arith.constant 0 : index
      %c0_18 = arith.constant 0 : index
      %20 = vector.load %arg4[%c0_17, %c0_18] : memref<32x32xf32, #tpu.memory_space<vmem>>, vector<32x32xf32>
      %cst_19 = arith.constant dense<0.000000e+00> : vector<16x32xf32>
      %21 = tpu.matmul %19, %20, %cst_19 {dimension_numbers = #tpu.dot_dimension_numbers<[1], [0], [0], [1], [0, 0, 1, 1], [], []>} : vector<16x32xf32>, vector<32x32xf32>, vector<16x32xf32> -> vector<16x32xf32>
      %c0_20 = arith.constant 0 : index
      %c0_21 = arith.constant 0 : index
      %22 = vector.load %arg5[%c0_20, %c0_21] : memref<1x32xf32, #tpu.memory_space<vmem>>, vector<1x32xf32>
      %23 = vector.broadcast %22 : vector<1x32xf32> to vector<16x32xf32>
      %24 = arith.addf %21, %23 : vector<16x32xf32>
      %c0_22 = arith.constant 0 : index
      %c0_23 = arith.constant 0 : index
      %25 = vector.load %arg3[%c0_22, %c0_23] : memref<16x32xf32, #tpu.memory_space<vmem>>, vector<16x32xf32>
      %26 = arith.addf %25, %24 : vector<16x32xf32>
      %c0_24 = arith.constant 0 : index
      %c0_25 = arith.constant 0 : index
      %27 = vector.load %arg6[%c0_24, %c0_25] : memref<1x32xf32, #tpu.memory_space<vmem>>, vector<1x32xf32>
      %c0_26 = arith.constant 0 : index
      %c0_27 = arith.constant 0 : index
      %28 = vector.load %arg7[%c0_26, %c0_27] : memref<1x32xf32, #tpu.memory_space<vmem>>, vector<1x32xf32>
      %cst_28 = arith.constant dense<0.000000e+00> : vector<16xf32>
      %29 = vector.multi_reduction <add>, %26, %cst_28 [1] : vector<16x32xf32> to vector<16xf32>
      %30 = vector.shape_cast %29 : vector<16xf32> to vector<16x1xf32>
      %cst_29 = arith.constant 3.200000e+01 : f32
      %31 = vector.broadcast %cst_29 : f32 to vector<16x1xf32>
      %32 = arith.divf %30, %31 : vector<16x1xf32>
      %33 = vector.broadcast %32 : vector<16x1xf32> to vector<16x32xf32>
      %34 = arith.subf %26, %33 : vector<16x32xf32>
      %35 = arith.mulf %34, %34 : vector<16x32xf32>
      %cst_30 = arith.constant dense<0.000000e+00> : vector<16xf32>
      %36 = vector.multi_reduction <add>, %35, %cst_30 [1] : vector<16x32xf32> to vector<16xf32>
      %37 = vector.shape_cast %36 : vector<16xf32> to vector<16x1xf32>
      %cst_31 = arith.constant 3.200000e+01 : f32
      %38 = vector.broadcast %cst_31 : f32 to vector<16x1xf32>
      %39 = arith.divf %37, %38 : vector<16x1xf32>
      %40 = vector.broadcast %32 : vector<16x1xf32> to vector<16x32xf32>
      %41 = arith.subf %26, %40 : vector<16x32xf32>
      %cst_32 = arith.constant 9.99999974E-6 : f32
      %42 = vector.broadcast %cst_32 : f32 to vector<16x1xf32>
      %43 = arith.addf %39, %42 : vector<16x1xf32>
      %44 = math.rsqrt %43 : vector<16x1xf32>
      %45 = vector.broadcast %44 : vector<16x1xf32> to vector<16x32xf32>
      %46 = arith.mulf %41, %45 : vector<16x32xf32>
      %47 = vector.broadcast %27 : vector<1x32xf32> to vector<16x32xf32>
      %48 = arith.mulf %46, %47 : vector<16x32xf32>
      %49 = vector.broadcast %28 : vector<1x32xf32> to vector<16x32xf32>
      %50 = arith.addf %48, %49 : vector<16x32xf32>
      %c0_33 = arith.constant 0 : index
      %c0_34 = arith.constant 0 : index
      %51 = vector.load %arg15[%c0_33, %c0_34] : memref<16x32xf32, #tpu.memory_space<vmem>>, vector<16x32xf32>
      tpu.vector_store %arg15[%c0_33, %c0_34], %50 {strides = array<i32>} : memref<16x32xf32, #tpu.memory_space<vmem>>, vector<16x32xf32>,
      %cst_35 = arith.constant 0.000000e+00 : f32
      %52 = vector.broadcast %cst_35 : f32 to vector<16x32xf32>
      %c0_36 = arith.constant 0 : index
      %c0_37 = arith.constant 0 : index
      %53 = vector.load %arg16[%c0_36, %c0_37] : memref<16x32xf32, #tpu.memory_space<vmem>>, vector<16x32xf32>
      tpu.vector_store %arg16[%c0_36, %c0_37], %52 {strides = array<i32>} : memref<16x32xf32, #tpu.memory_space<vmem>>, vector<16x32xf32>,
    } else {
    }
    %c0 = arith.constant 0 : index
    %c0_1 = arith.constant 0 : index
    %3 = vector.load %arg15[%c0, %c0_1] : memref<16x32xf32, #tpu.memory_space<vmem>>, vector<16x32xf32>
    %c0_2 = arith.constant 0 : index
    %c0_3 = arith.constant 0 : index
    %4 = vector.load %arg8[%c0_2, %c0_3] : memref<32x128xf32, #tpu.memory_space<vmem>>, vector<32x128xf32>
    %cst = arith.constant dense<0.000000e+00> : vector<16x128xf32>
    %5 = tpu.matmul %3, %4, %cst {dimension_numbers = #tpu.dot_dimension_numbers<[1], [0], [0], [1], [0, 0, 1, 1], [], []>} : vector<16x32xf32>, vector<32x128xf32>, vector<16x128xf32> -> vector<16x128xf32>
    %c0_4 = arith.constant 0 : index
    %c0_5 = arith.constant 0 : index
    %6 = vector.load %arg9[%c0_4, %c0_5] : memref<1x128xf32, #tpu.memory_space<vmem>>, vector<1x128xf32>
    %7 = vector.broadcast %6 : vector<1x128xf32> to vector<16x128xf32>
    %8 = arith.addf %5, %7 : vector<16x128xf32>
    %cst_6 = arith.constant 0.000000e+00 : f32
    %9 = vector.broadcast %cst_6 : f32 to vector<16x128xf32>
    %10 = arith.maximumf %8, %9 : vector<16x128xf32>
    %c0_7 = arith.constant 0 : index
    %c0_8 = arith.constant 0 : index
    %11 = vector.load %arg16[%c0_7, %c0_8] : memref<16x32xf32, #tpu.memory_space<vmem>>, vector<16x32xf32>
    %c0_9 = arith.constant 0 : index
    %c0_10 = arith.constant 0 : index
    %12 = vector.load %arg10[%c0_9, %c0_10] : memref<128x32xf32, #tpu.memory_space<vmem>>, vector<128x32xf32>
    %cst_11 = arith.constant dense<0.000000e+00> : vector<16x32xf32>
    %13 = tpu.matmul %10, %12, %cst_11 {dimension_numbers = #tpu.dot_dimension_numbers<[1], [0], [0], [1], [0, 0, 1, 1], [], []>} : vector<16x128xf32>, vector<128x32xf32>, vector<16x32xf32> -> vector<16x32xf32>
    %14 = arith.addf %11, %13 : vector<16x32xf32>
    %c0_12 = arith.constant 0 : index
    %c0_13 = arith.constant 0 : index
    %15 = vector.load %arg16[%c0_12, %c0_13] : memref<16x32xf32, #tpu.memory_space<vmem>>, vector<16x32xf32>
    tpu.vector_store %arg16[%c0_12, %c0_13], %14 {strides = array<i32>} : memref<16x32xf32, #tpu.memory_space<vmem>>, vector<16x32xf32>,
    %c1_i32 = arith.constant 1 : i32
    %16 = arith.cmpi eq, %arg1, %c1_i32 : i32
    %17 = arith.extui %16 : i1 to i32
    %c0_i32_14 = arith.constant 0 : i32
    %18 = arith.cmpi ne, %17, %c0_i32_14 : i32
    scf.if %18 {
      %c0_15 = arith.constant 0 : index
      %c0_16 = arith.constant 0 : index
      %19 = vector.load %arg15[%c0_15, %c0_16] : memref<16x32xf32, #tpu.memory_space<vmem>>, vector<16x32xf32>
      %c0_17 = arith.constant 0 : index
      %c0_18 = arith.constant 0 : index
      %20 = vector.load %arg16[%c0_17, %c0_18] : memref<16x32xf32, #tpu.memory_space<vmem>>, vector<16x32xf32>
      %21 = arith.addf %19, %20 : vector<16x32xf32>
      %c0_19 = arith.constant 0 : index
      %c0_20 = arith.constant 0 : index
      %22 = vector.load %arg11[%c0_19, %c0_20] : memref<1x32xf32, #tpu.memory_space<vmem>>, vector<1x32xf32>
      %23 = vector.broadcast %22 : vector<1x32xf32> to vector<16x32xf32>
      %24 = arith.addf %21, %23 : vector<16x32xf32>
      %c0_21 = arith.constant 0 : index
      %c0_22 = arith.constant 0 : index
      %25 = vector.load %arg12[%c0_21, %c0_22] : memref<1x32xf32, #tpu.memory_space<vmem>>, vector<1x32xf32>
      %c0_23 = arith.constant 0 : index
      %c0_24 = arith.constant 0 : index
      %26 = vector.load %arg13[%c0_23, %c0_24] : memref<1x32xf32, #tpu.memory_space<vmem>>, vector<1x32xf32>
      %cst_25 = arith.constant dense<0.000000e+00> : vector<16xf32>
      %27 = vector.multi_reduction <add>, %24, %cst_25 [1] : vector<16x32xf32> to vector<16xf32>
      %28 = vector.shape_cast %27 : vector<16xf32> to vector<16x1xf32>
      %cst_26 = arith.constant 3.200000e+01 : f32
      %29 = vector.broadcast %cst_26 : f32 to vector<16x1xf32>
      %30 = arith.divf %28, %29 : vector<16x1xf32>
      %31 = vector.broadcast %30 : vector<16x1xf32> to vector<16x32xf32>
      %32 = arith.subf %24, %31 : vector<16x32xf32>
      %33 = arith.mulf %32, %32 : vector<16x32xf32>
      %cst_27 = arith.constant dense<0.000000e+00> : vector<16xf32>
      %34 = vector.multi_reduction <add>, %33, %cst_27 [1] : vector<16x32xf32> to vector<16xf32>
      %35 = vector.shape_cast %34 : vector<16xf32> to vector<16x1xf32>
      %cst_28 = arith.constant 3.200000e+01 : f32
      %36 = vector.broadcast %cst_28 : f32 to vector<16x1xf32>
      %37 = arith.divf %35, %36 : vector<16x1xf32>
      %38 = vector.broadcast %30 : vector<16x1xf32> to vector<16x32xf32>
      %39 = arith.subf %24, %38 : vector<16x32xf32>
      %cst_29 = arith.constant 9.99999974E-6 : f32
      %40 = vector.broadcast %cst_29 : f32 to vector<16x1xf32>
      %41 = arith.addf %37, %40 : vector<16x1xf32>
      %42 = math.rsqrt %41 : vector<16x1xf32>
      %43 = vector.broadcast %42 : vector<16x1xf32> to vector<16x32xf32>
      %44 = arith.mulf %39, %43 : vector<16x32xf32>
      %45 = vector.broadcast %25 : vector<1x32xf32> to vector<16x32xf32>
      %46 = arith.mulf %44, %45 : vector<16x32xf32>
      %47 = vector.broadcast %26 : vector<1x32xf32> to vector<16x32xf32>
      %48 = arith.addf %46, %47 : vector<16x32xf32>
      %c0_30 = arith.constant 0 : index
      %c0_31 = arith.constant 0 : index
      %49 = vector.load %arg14[%c0_30, %c0_31] : memref<16x32xf32, #tpu.memory_space<vmem>>, vector<16x32xf32>
      tpu.vector_store %arg14[%c0_30, %c0_31], %48 {strides = array<i32>} : memref<16x32xf32, #tpu.memory_space<vmem>>, vector<16x32xf32>,
    } else {
    }
    return
  }
  func.func @transform_0(%arg0: i32, %arg1: i32) -> (i32, i32) {
    %c0_i32 = arith.constant 0 : i32
    %c0_i32_0 = arith.constant 0 : i32
    return %arg0, %c0_i32 : i32, i32
  }
  func.func @transform_1(%arg0: i32, %arg1: i32) -> (i32, i32) {
    %c0_i32 = arith.constant 0 : i32
    %c0_i32_0 = arith.constant 0 : i32
    return %arg0, %c0_i32 : i32, i32
  }
  func.func @transform_2(%arg0: i32, %arg1: i32) -> (i32, i32) {
    %c0_i32 = arith.constant 0 : i32
    %c0_i32_0 = arith.constant 0 : i32
    %c0_i32_1 = arith.constant 0 : i32
    return %c0_i32, %c0_i32_0 : i32, i32
  }
  func.func @transform_3(%arg0: i32, %arg1: i32) -> (i32, i32) {
    %c0_i32 = arith.constant 0 : i32
    %c0_i32_0 = arith.constant 0 : i32
    %c0_i32_1 = arith.constant 0 : i32
    return %c0_i32, %c0_i32_0 : i32, i32
  }
  func.func @transform_4(%arg0: i32, %arg1: i32) -> (i32, i32) {
    %c0_i32 = arith.constant 0 : i32
    %c0_i32_0 = arith.constant 0 : i32
    %c0_i32_1 = arith.constant 0 : i32
    return %c0_i32, %c0_i32_0 : i32, i32
  }
  func.func @transform_5(%arg0: i32, %arg1: i32) -> (i32, i32) {
    %c0_i32 = arith.constant 0 : i32
    %c0_i32_0 = arith.constant 0 : i32
    %c0_i32_1 = arith.constant 0 : i32
    return %c0_i32, %c0_i32_0 : i32, i32
  }
  func.func @transform_6(%arg0: i32, %arg1: i32) -> (i32, i32) {
    %c0_i32 = arith.constant 0 : i32
    %c0_i32_0 = arith.constant 0 : i32
    return %c0_i32, %arg1 : i32, i32
  }
  func.func @transform_7(%arg0: i32, %arg1: i32) -> (i32, i32) {
    %c0_i32 = arith.constant 0 : i32
    %c0_i32_0 = arith.constant 0 : i32
    return %c0_i32, %arg1 : i32, i32
  }
  func.func @transform_8(%arg0: i32, %arg1: i32) -> (i32, i32) {
    %c0_i32 = arith.constant 0 : i32
    %c0_i32_0 = arith.constant 0 : i32
    return %arg1, %c0_i32 : i32, i32
  }
  func.func @transform_9(%arg0: i32, %arg1: i32) -> (i32, i32) {
    %c0_i32 = arith.constant 0 : i32
    %c0_i32_0 = arith.constant 0 : i32
    %c0_i32_1 = arith.constant 0 : i32
    return %c0_i32, %c0_i32_0 : i32, i32
  }
  func.func @transform_10(%arg0: i32, %arg1: i32) -> (i32, i32) {
    %c0_i32 = arith.constant 0 : i32
    %c0_i32_0 = arith.constant 0 : i32
    %c0_i32_1 = arith.constant 0 : i32
    return %c0_i32, %c0_i32_0 : i32, i32
  }
  func.func @transform_11(%arg0: i32, %arg1: i32) -> (i32, i32) {
    %c0_i32 = arith.constant 0 : i32
    %c0_i32_0 = arith.constant 0 : i32
    %c0_i32_1 = arith.constant 0 : i32
    return %c0_i32, %c0_i32_0 : i32, i32
  }
  func.func @transform_12(%arg0: i32, %arg1: i32) -> (i32, i32) {
    %c0_i32 = arith.constant 0 : i32
    %c0_i32_0 = arith.constant 0 : i32
    return %arg0, %c0_i32 : i32, i32
  }
}

</mosaic_0001>

<bundles_post_ra>
// kernel: asl_transformer_decoder.10
= control target key start
LH: loop header
LB: loop body
LE: loop exit
PB: predicated region body
PF: predicated region fallthrough
CT: control target
= control target key end

     0   :  { %8 = vsyncpa [#allocation3], 0  ;;  %s185_s12 = smov [#allocation2]   ;;  %s245_s0 = inlined_call_operand.hbm [shape: f32[16,32], index: 0, kind: input, shape index: {}]   ;;  %s246_s1 = inlined_call_operand.vmem [shape: f32[32,32], index: 1, kind: input, shape index: {}]   ;;  %s247_s2 = inlined_call_operand.vmem [shape: f32[1,32], index: 2, kind: input, shape index: {}]   ;;  %s248_s3 = inlined_call_operand.vmem [shape: f32[16,32], index: 3, kind: output, shape index: {}]  }
   0x1   :  { %s14_s13 = sshll.u32 %s185_s12, 4  ;;  %s161_s16 = scalar_lea.hbm %s245_s0, 256  ;;  %s15_s13 = int_to_ptr.vmem [resolvable:$true] %s14_s13 }
   0x2   :  { %p162_p0 = scmp.ne.s32.totalorder %s245_s0, %s161_s16  ;;  %p165_p1 = scmp.lt.u32.totalorder %s161_s16, %s245_s0 }
   0x4   :  { %p167_p2 = pnand %p165_p1, %p162_p0 }
   0x6   :  { %170 = shalt.err (!%p167_p2)
}
   0x7   :  { %s171_s21 = scalar_lea.vmem %s15_s13, 256  ;;  %p176_p4 = scmp.lt.s32.totalorder %s15_s13, %s15_s13 }
   0x8   :  { %p172_p3 = scmp.ne.s32.totalorder %s15_s13, %s171_s21  ;;  %p177_p5 = scmp.lt.s32.totalorder %s171_s21, %s171_s21 }
   0xa   :  { %p178_p6 = por %p177_p5, %p176_p4 }
   0xc   :  { %p179_p7 = pnand %p178_p6, %p172_p3 }
   0xe   :  { %182 = shalt.err (!%p179_p7)
}
   0xf   :  { %s186_s22 = smov 128   ;;  %s187_s23 = smov 8  }
  0x10   :  { %20 = dma.hbm_to_vmem [thread:$0]  %s245_s0, 256, %s15_s13, [#allocation3], %s186_s22, %s186_s22, %s187_s23  }
  0x11   :  { %183 = dma.done.wait [#allocation3], 256  }
  0x12   :  { %184 = vsyncadd [#allocation3], 4294967040  ;;  %vm41_vm0 = vcmask 261120   ;;  %v30_v0 = vld [vmem:[%s246_s1] sm:$0xff]  ;;  %v31_v1 = vld [vmem:[%s246_s1 + $0x8] sm:$0xff] }
  0x13   :  { %v32_v2 = vld [vmem:[%s246_s1 + $0x10] sm:$0xff]  ;;  %v150_v3 = vpack.c.bf16 %v31_v1, %v30_v0  ;;  %v33_v4 = vld [vmem:[%s246_s1 + $0x18] sm:$0xff]  ;;  %v28_v5 = vld [vmem:[#allocation2] sm:$0xff] }
  0x14   :  { %v154_v6 = vpack.c.bf16 %v33_v4, %v32_v2  ;;  %147 = vmatprep.mubr.msk.f32.mxu0 %vm41_vm0, %v28_v5  ;;  %v29_v7 = vld [vmem:[#allocation2 + $0x8] sm:$0xff]  ;;  %v130_v8 = vld [vmem:[%s247_s2] ss:$0 sm:$0xff] }
  0x15   :  { %151 = vmatprep.subr.bf16.mxu0 %v150_v3 }
  0x16   :  { %153 = vmatpush3.bf16.msra.mxu0 %v150_v3 }
  0x17   :  { %155 = vmatprep.subr.bf16.mxu0 %v154_v6 }
  0x1a   :  { %157 = vmatpush3.bf16.msra.mxu0 %v154_v6 }
  0x1d   :  { %148 = vmatmul.mubr.msk.f32.vlgmr.msra.gmra.mrb[0].mxu0 %vm41_vm0, %v29_v7 }
  0xf0   :  { %v149_v9 = vpop.f32.mrb[0].mxu0 }
  0xf1   :  { %v120_v10 = vadd.f32 %v149_v9, %v130_v8  ;;  %v114_v11 = vpop.f32.mrb[1].mxu0 }
  0xf2   :  { %v115_v12 = vadd.f32 %v130_v8, %v114_v11 }
  0xf3   :  { %124 = vst.msk [vmem:[%s248_s3 + $0x8] sm:$0xff] %vm41_vm0, %v120_v10 }
  0xf4   :  { %123 = vst.msk [vmem:[%s248_s3] sm:$0xff] %vm41_vm0, %v115_v12 }
  0xf5   :  { %129 = vsyncpa [#allocation3], 1 }

// kernel: asl_transformer_decoder.11
= control target key start
LH: loop header
LB: loop body
LE: loop exit
PB: predicated region body
PF: predicated region fallthrough
CT: control target
= control target key end

     0   :  { %s386_s6 = smov 0   ;;  %s409_s0 = inlined_call_operand.vmem [shape: f32[8,8,8], index: 0, kind: input, shape index: {}]   ;;  %s410_s1 = inlined_call_operand.vmem [shape: f32[8,8,8], index: 1, kind: output, shape index: {}]  }
   0x1 LB: > { %s326_s7 = sadd.s32 4294967295, %s372_s6   ;;  %p330_p0 = scmp.ge.s32.totalorder %s372_s6, 1  ;;  %s372_s6 = sphi %s386_s6, %s11_s6  }
   0x2   : > { %p86_p1 = scmp.lt.s32.totalorder %s372_s6, 9 }
   0x4   : > { %p87_p2 = pnand %p330_p0, %p86_p1 }
   0x5   : > { %p104_p3 = scmp.lt.s32.totalorder (!%p87_p2), %s326_s7, 7  ;;  %v374_v0 = vmov (!%p87_p2), 0.0   ;;  %vm375_vm0 = vmmov (!%p87_p2), 0   ;;  %vm113_vm1 = vcmask (!%p87_p2), 64512  }
   0x6   : > { %90 = sbr.rel (%p87_p2) target bundleno = 761 (0x2f9), region = 24  ;;  %342 = vmatprep.subr.mxu0 (!%p87_p2), %v374_v0  ;;  %344 = vmatprep.mubr.msk.f32.mxu0 (!%p87_p2), %vm375_vm0, %v374_v0 }
   0x7   : > { %347 = vmatprep.subr.mxu1 (!%p87_p2), %v374_v0  ;;  %349 = vmatprep.mubr.msk.f32.mxu1 (!%p87_p2), %vm375_vm0, %v374_v0 }
   0xd   : > { %s412_s7 = smov (!%p104_p3, %s326_s7), 7 }
   0xe   : > { %s331_s8 = sshll.u32 %s412_s7, 3 }
   0xf   : > { %s107_s11 = scalar_lea.vmem %s409_s0, %s331_s8  ;;  %s111_s14 = scalar_lea.vmem %s410_s1, %s331_s8 }
  0x10   : > { %v112_v1 = vld [vmem:[%s107_s11] sm:$0xff] }
  0x11   : > { %343 = vmatpush3.xpose.msk.msra.mxu0 %vm113_vm1, %v112_v1  ;;  %348 = vmatpush3.msra.mxu1 %v112_v1 }
  0x14   : > { %345 = vmatmul.mubr.msk.f32.vlgmr.msra.gmra.mrb[0].mxu0 %vm113_vm1, %v112_v1 }
  0xe7   : > { %v183_v2 = vpop.f32.mrb[0].mxu0 }
  0xe8   : > { %v187_v3 = vmul.f32 0.35355338, %v183_v2  ;;  %v346_v4 = vpop.f32.mrb[1].mxu0 }
  0xea   : > { %v188_v5 = vsel %vm113_vm1, %v187_v3, -inf }
  0xeb   : > { %189 = vmax.xlane.f32.xlu0 %v188_v5 }
 0x178   : > { %v190_v6 = vpop.xlane.xlu0 %189 }
 0x179   : > { %v191_v7 = vsub.f32 %v187_v3, %v190_v6 }
 0x17b   : > { %v192_v8 = vmul.f32 1.442695, %v191_v7 }
 0x17d   : > { %362 = vpow2.f32 %v192_v8 }
 0x187   : > { %v363_v9 = vpop.eup %362 }
 0x188   : > { %v194_v10 = vsel %vm113_vm1, %v363_v9, 0.0 }
 0x189   : > { %195 = vadd.xlane.f32.xlu0 %v194_v10 }
 0x216   : > { %v196_v11 = vpop.xlane.xlu0 %195 }
 0x217   : > { %364 = vrcp.f32 %v196_v11 }
 0x221   : > { %v365_v12 = vpop.eup %364 }
 0x222   : > { %v198_v13 = vmul.f32 %v365_v12, %v363_v9 }
 0x224   : > { %350 = vmatmul.mubr.msk.f32.vlgmr.msra.gmra.mrb[0].mxu1 %vm113_vm1, %v198_v13 }
 0x2f7   : > { %v268_v14 = vpop.f32.mrb[0].mxu1 }
 0x2f8   : > { %272 = vst.msk [vmem:[%s111_s14] sm:$0xff] %vm113_vm1, %v268_v14  ;;  %v351_v15 = vpop.f32.mrb[1].mxu1 }
 0x2f9 PF: > { %s11_s6 = sadd.s32 1, %s372_s6  }
 0x2fa   : > { %p8_p4 = scmp.ge.s32.totalorder %s11_s6, 10  }
 0x2fc   :  { %10 = sbr.rel (!%p8_p4) target bundleno = 1 (0x1), region = 54 }

// kernel: asl_transformer_decoder.13
= control target key start
LH: loop header
LB: loop body
LE: loop exit
PB: predicated region body
PF: predicated region fallthrough
CT: control target
= control target key end

     0   :  { %s452_s9 = smov 0   ;;  %s478_s0 = inlined_call_operand.vmem [shape: f32[8,8,8], index: 0, kind: input, shape index: {}]   ;;  %s479_s1 = inlined_call_operand.vmem [shape: f32[8,8,8], index: 1, kind: input, shape index: {}]   ;;  %s480_s2 = inlined_call_operand.vmem [shape: f32[8,8,8], index: 2, kind: output, shape index: {}]  }
   0x1 LB: > { %s386_s10 = sadd.s32 4294967295, %s433_s9   ;;  %p390_p0 = scmp.ge.s32.totalorder %s433_s9, 1  ;;  %s433_s9 = sphi %s452_s9, %s12_s9  }
   0x2   : > { %p120_p1 = scmp.lt.s32.totalorder %s433_s9, 9 }
   0x4   : > { %p121_p2 = pnand %p390_p0, %p120_p1 }
   0x5   : > { %p144_p3 = scmp.lt.s32.totalorder (!%p121_p2), %s386_s10, 7  ;;  %v435_v0 = vmov (!%p121_p2), 0.0   ;;  %vm436_vm0 = vmmov (!%p121_p2), 0   ;;  %vm158_vm1 = vcmask (!%p121_p2), 64512  }
   0x6   : > { %124 = sbr.rel (%p121_p2) target bundleno = 761 (0x2f9), region = 28  ;;  %403 = vmatprep.subr.mxu0 (!%p121_p2), %v435_v0  ;;  %405 = vmatprep.mubr.msk.f32.mxu0 (!%p121_p2), %vm436_vm0, %v435_v0 }
   0x7   : > { %408 = vmatprep.subr.mxu1 (!%p121_p2), %v435_v0  ;;  %410 = vmatprep.mubr.msk.f32.mxu1 (!%p121_p2), %vm436_vm0, %v435_v0 }
   0xd   : > { %s482_s10 = smov (!%p144_p3, %s386_s10), 7 }
   0xe   : > { %s391_s11 = sshll.u32 %s482_s10, 3 }
   0xf   : > { %s151_s14 = scalar_lea.vmem %s479_s1, %s391_s11  ;;  %s147_s17 = scalar_lea.vmem %s478_s0, %s391_s11 }
  0x10   : > { %v157_v1 = vld [vmem:[%s151_s14] sm:$0xff]  ;;  %s155_s20 = scalar_lea.vmem %s480_s2, %s391_s11 }
  0x11   : > { %404 = vmatpush3.xpose.msk.msra.mxu0 %vm158_vm1, %v157_v1  ;;  %v156_v2 = vld [vmem:[%s147_s17] sm:$0xff]  ;;  %409 = vmatpush3.msra.mxu1 %v157_v1 }
  0x14   : > { %406 = vmatmul.mubr.msk.f32.vlgmr.msra.gmra.mrb[0].mxu0 %vm158_vm1, %v156_v2 }
  0xe7   : > { %v231_v3 = vpop.f32.mrb[0].mxu0 }
  0xe8   : > { %v235_v4 = vmul.f32 0.35355338, %v231_v3  ;;  %v407_v5 = vpop.f32.mrb[1].mxu0 }
  0xea   : > { %v236_v6 = vsel %vm158_vm1, %v235_v4, -inf }
  0xeb   : > { %237 = vmax.xlane.f32.xlu0 %v236_v6 }
 0x178   : > { %v238_v7 = vpop.xlane.xlu0 %237 }
 0x179   : > { %v239_v8 = vsub.f32 %v235_v4, %v238_v7 }
 0x17b   : > { %v240_v9 = vmul.f32 1.442695, %v239_v8 }
 0x17d   : > { %423 = vpow2.f32 %v240_v9 }
 0x187   : > { %v424_v10 = vpop.eup %423 }
 0x188   : > { %v242_v11 = vsel %vm158_vm1, %v424_v10, 0.0 }
 0x189   : > { %243 = vadd.xlane.f32.xlu0 %v242_v11 }
 0x216   : > { %v244_v12 = vpop.xlane.xlu0 %243 }
 0x217   : > { %425 = vrcp.f32 %v244_v12 }
 0x221   : > { %v426_v13 = vpop.eup %425 }
 0x222   : > { %v246_v14 = vmul.f32 %v426_v13, %v424_v10 }
 0x224   : > { %411 = vmatmul.mubr.msk.f32.vlgmr.msra.gmra.mrb[0].mxu1 %vm158_vm1, %v246_v14 }
 0x2f7   : > { %v316_v15 = vpop.f32.mrb[0].mxu1 }
 0x2f8   : > { %320 = vst.msk [vmem:[%s155_s20] sm:$0xff] %vm158_vm1, %v316_v15  ;;  %v412_v16 = vpop.f32.mrb[1].mxu1 }
 0x2f9 PF: > { %s12_s9 = sadd.s32 1, %s433_s9  }
 0x2fa   : > { %p9_p4 = scmp.ge.s32.totalorder %s12_s9, 10  }
 0x2fc   :  { %11 = sbr.rel (!%p9_p4) target bundleno = 1 (0x1), region = 61 }

// kernel: asl_transformer_decoder.12
= control target key start
LH: loop header
LB: loop body
LE: loop exit
PB: predicated region body
PF: predicated region fallthrough
CT: control target
= control target key end

     0   :  { %vm48_vm0 = vcmask 261120   ;;  %s621_s3 = inlined_call_operand.vmem [shape: f32[32,32], index: 3, kind: input, shape index: {}]   ;;  %s622_s0 = inlined_call_operand.vmem [shape: f32[16,32], index: 0, kind: input, shape index: {}]   ;;  %s623_s4 = inlined_call_operand.vmem [shape: f32[1,32], index: 4, kind: input, shape index: {}]   ;;  %s624_s1 = inlined_call_operand.vmem [shape: f32[16,32], index: 1, kind: input, shape index: {}]   ;;  %s625_s7 = inlined_call_operand.vmem [shape: f32[32,32], index: 7, kind: input, shape index: {}]   ;;  %s626_s2 = inlined_call_operand.vmem [shape: f32[16,32], index: 2, kind: input, shape index: {}]   ;;  %s627_s5 = inlined_call_operand.vmem [shape: f32[1,32], index: 5, kind: input, shape index: {}]   ;;  %s628_s6 = inlined_call_operand.vmem [shape: f32[1,32], index: 6, kind: input, shape index: {}]   ;;  %s629_s9 = inlined_call_operand.vmem [shape: f32[16,32], index: 9, kind: output, shape index: {0}]   ;;  %s630_s8 = inlined_call_operand.vmem [shape: f32[1,32], index: 8, kind: input, shape index: {}]   ;;  %s631_s11 = inlined_call_operand.vmem [shape: f32[16,32], index: 11, kind: output, shape index: {2}]   ;;  %s632_s10 = inlined_call_operand.vmem [shape: f32[16,32], index: 10, kind: output, shape index: {1}]  }
   0x1   :  { %v37_v0 = vld [vmem:[%s621_s3] sm:$0xff]  ;;  %v38_v1 = vld [vmem:[%s621_s3 + $0x8] sm:$0xff]  ;;  %v39_v2 = vld [vmem:[%s621_s3 + $0x10] sm:$0xff] }
   0x2   :  { %v445_v3 = vpack.c.bf16 %v38_v1, %v37_v0  ;;  %v40_v4 = vld [vmem:[%s621_s3 + $0x18] sm:$0xff]  ;;  %v35_v5 = vld [vmem:[%s622_s0] sm:$0xff]  ;;  %v36_v7 = vld [vmem:[%s622_s0 + $0x8] sm:$0xff] }
   0x3   :  { %v449_v6 = vpack.c.bf16 %v40_v4, %v39_v2  ;;  %420 = vmatprep.mubr.msk.f32.mxu0 %vm48_vm0, %v35_v5  ;;  %v383_v8 = vld [vmem:[%s623_s4] ss:$0 sm:$0xff]  ;;  %v131_v14 = vld [vmem:[%s624_s1 + $0x8] sm:$0xff]  ;;  %v279_v31 = vld [vmem:[%s625_s7 + $0x10] sm:$0xff] }
   0x4   :  { %446 = vmatprep.subr.bf16.mxu0 %v445_v3  ;;  %v130_v11 = vld [vmem:[%s624_s1] sm:$0xff]  ;;  %v278_v30 = vld [vmem:[%s625_s7 + $0x8] sm:$0xff]  ;;  %v280_v33 = vld [vmem:[%s625_s7 + $0x18] sm:$0xff] }
   0x5   :  { %448 = vmatpush3.bf16.msra.mxu0 %v445_v3  ;;  %v277_v29 = vld [vmem:[%s625_s7] sm:$0xff]  ;;  %v465_v34 = vpack.c.bf16 %v280_v33, %v279_v31  ;;  %v276_v36 = vld [vmem:[%s626_s2 + $0x8] sm:$0xff] }
   0x6   :  { %450 = vmatprep.subr.bf16.mxu0 %v449_v6  ;;  %v461_v32 = vpack.c.bf16 %v278_v30, %v277_v29  ;;  %v275_v35 = vld [vmem:[%s626_s2] sm:$0xff] }
   0x7   :  { %v386_v44 = vld [vmem:[%s627_s5] ss:$0 sm:$0xff] }
   0x8   :  { %454 = vmatprep.subr.bf16.mxu1 %v461_v32  ;;  %v387_v46 = vld [vmem:[%s628_s6] ss:$0 sm:$0xff] }
   0x9   :  { %452 = vmatpush3.bf16.msra.mxu0 %v449_v6  ;;  %456 = vmatpush3.bf16.msra.mxu1 %v461_v32  ;;  %v391_v53 = vld [vmem:[%s630_s8] ss:$0 sm:$0xff] }
   0xa   :  { %462 = vmatprep.subr.bf16.mxu0 %v461_v32  ;;  %458 = vmatprep.subr.bf16.mxu1 %v465_v34 }
   0xc   :  { %421 = vmatmul.mubr.msk.f32.vlgmr.msra.gmra.mrb[0].mxu0 %vm48_vm0, %v36_v7 }
   0xd   :  { %464 = vmatpush3.bf16.msra.mxu0 %v461_v32  ;;  %460 = vmatpush3.bf16.msra.mxu1 %v465_v34 }
   0xe   :  { %466 = vmatprep.subr.bf16.mxu0 %v465_v34  ;;  %442 = vmatprep.mubr.msk.f32.mxu0 %vm48_vm0, %v275_v35 }
  0x11   :  { %468 = vmatpush3.bf16.msra.mxu0 %v465_v34 }
  0x14   :  { %443 = vmatmul.mubr.msk.f32.vlgmr.msra.gmra.mrb[2].mxu0 %vm48_vm0, %v276_v36 }
  0xdf   :  { %v422_v9 = vpop.f32.mrb[0].mxu0 }
  0xe0   :  { %v121_v10 = vpop.f32.mrb[1].mxu0  ;;  %v127_v12 = vadd.f32 %v422_v9, %v383_v8 }
  0xe1   :  { %v122_v13 = vadd.f32 %v383_v8, %v121_v10 }
  0xe2   :  { %v133_v17 = vadd.f32 %v131_v14, %v127_v12 }
  0xe3   :  { %v132_v15 = vadd.f32 %v130_v11, %v122_v13 }
  0xe4   :  { %v139_v18 = vsel %vm48_vm0, %v133_v17, 0.0 }
  0xe5   :  { %v136_v16 = vsel %vm48_vm0, %v132_v15, 0.0 }
  0xe6   :  { %137 = vadd.xlane.f32.xlu0 %v136_v16 }
  0xe7   :  { %v444_v54 = vpop.f32.mrb[2].mxu0 }
  0xe8   :  { %v366_v55 = vadd.f32 %v444_v54, %v391_v53  ;;  %v360_v56 = vpop.f32.mrb[3].mxu0 }
  0xe9   :  { %v361_v57 = vadd.f32 %v391_v53, %v360_v56 }
  0xea   :  { %140 = vadd.xlane.f32.xlu0 %v139_v18  ;;  %370 = vst.msk [vmem:[%s631_s11 + $0x8] sm:$0xff] %vm48_vm0, %v366_v55 }
  0xeb   :  { %369 = vst.msk [vmem:[%s631_s11] sm:$0xff] %vm48_vm0, %v361_v57 }
 0x173   :  { %v138_v19 = vpop.xlane.xlu0 %137 }
 0x174   :  { %v143_v20 = vmul.f32 0.03125, %v138_v19 }
 0x176   :  { %v145_v21 = vsub.f32 %v132_v15, %v143_v20 }
 0x177   :  { %v141_v22 = vpop.xlane.xlu0 %140 }
 0x178   :  { %v144_v23 = vmul.f32 0.03125, %v141_v22  ;;  %v147_v24 = vmul.f32 %v145_v21, %v145_v21 }
 0x17a   :  { %v146_v25 = vsub.f32 %v133_v17, %v144_v23  ;;  %v149_v26 = vsel %vm48_vm0, %v147_v24, 0.0 }
 0x17b   :  { %150 = vadd.xlane.f32.xlu1 %v149_v26 }
 0x17c   :  { %v148_v27 = vmul.f32 %v146_v25, %v146_v25 }
 0x17e   :  { %v152_v28 = vsel %vm48_vm0, %v148_v27, 0.0 }
 0x17f   :  { %153 = vadd.xlane.f32.xlu1 %v152_v28 }
 0x208   :  { %v151_v37 = vpop.xlane.xlu1 %150 }
 0x209   :  { %v155_v38 = vmul.f32 0.03125, %v151_v37 }
 0x20b   :  { %v157_v39 = vadd.f32 1e-05, %v155_v38 }
 0x20c   :  { %v154_v40 = vpop.xlane.xlu1 %153 }
 0x20d   :  { %469 = vrsqrt.f32 %v157_v39  ;;  %v156_v41 = vmul.f32 0.03125, %v154_v40 }
 0x20f   :  { %v158_v42 = vadd.f32 1e-05, %v156_v41 }
 0x211   :  { %471 = vrsqrt.f32 %v158_v42 }
 0x217   :  { %v470_v43 = vpop.eup %469 }
 0x218   :  { %v161_v45 = vmul.f32 %v470_v43, %v145_v21 }
 0x21a   :  { %v169_v47 = vmul.f32 %v386_v44, %v161_v45 }
 0x21b   :  { %v472_v48 = vpop.eup %471 }
 0x21c   :  { %v162_v49 = vmul.f32 %v472_v48, %v146_v25  ;;  %v177_v50 = vadd.f32 %v387_v46, %v169_v47 }
 0x21e   :  { %v170_v51 = vmul.f32 %v386_v44, %v162_v49  ;;  %179 = vst.msk [vmem:[%s629_s9] sm:$0xff] %vm48_vm0, %v177_v50  ;;  %431 = vmatprep.mubr.msk.f32.mxu1 %vm48_vm0, %v177_v50 }
 0x220   :  { %v178_v52 = vadd.f32 %v387_v46, %v170_v51 }
 0x222   :  { %180 = vst.msk [vmem:[%s629_s9 + $0x8] sm:$0xff] %vm48_vm0, %v178_v52  ;;  %432 = vmatmul.mubr.msk.f32.vlgmr.msra.gmra.mrb[0].mxu1 %vm48_vm0, %v178_v52 }
 0x2f5   :  { %v433_v58 = vpop.f32.mrb[0].mxu1 }
 0x2f6   :  { %v270_v59 = vadd.f32 %v433_v58, %v391_v53  ;;  %v264_v60 = vpop.f32.mrb[1].mxu1 }
 0x2f7   :  { %v265_v61 = vadd.f32 %v391_v53, %v264_v60 }
 0x2f8   :  { %274 = vst.msk [vmem:[%s632_s10 + $0x8] sm:$0xff] %vm48_vm0, %v270_v59 }
 0x2f9   :  { %273 = vst.msk [vmem:[%s632_s10] sm:$0xff] %vm48_vm0, %v265_v61 }

// kernel: asl_transformer_decoder.15
= control target key start
LH: loop header
LB: loop body
LE: loop exit
PB: predicated region body
PF: predicated region fallthrough
CT: control target
= control target key end

     0   :  { %vm27_vm0 = vcmask 261120   ;;  %s194_s1 = inlined_call_operand.vmem [shape: f32[32,32], index: 1, kind: input, shape index: {}]   ;;  %s195_s0 = inlined_call_operand.vmem [shape: f32[16,32], index: 0, kind: input, shape index: {}]   ;;  %s196_s2 = inlined_call_operand.vmem [shape: f32[1,32], index: 2, kind: input, shape index: {}]   ;;  %s197_s3 = inlined_call_operand.vmem [shape: f32[16,32], index: 3, kind: output, shape index: {}]  }
   0x1   :  { %v16_v0 = vld [vmem:[%s194_s1] sm:$0xff]  ;;  %v17_v1 = vld [vmem:[%s194_s1 + $0x8] sm:$0xff]  ;;  %v18_v2 = vld [vmem:[%s194_s1 + $0x10] sm:$0xff] }
   0x2   :  { %v135_v3 = vpack.c.bf16 %v17_v1, %v16_v0  ;;  %v19_v4 = vld [vmem:[%s194_s1 + $0x18] sm:$0xff]  ;;  %v14_v5 = vld [vmem:[%s195_s0] sm:$0xff]  ;;  %v15_v7 = vld [vmem:[%s195_s0 + $0x8] sm:$0xff] }
   0x3   :  { %v139_v6 = vpack.c.bf16 %v19_v4, %v18_v2  ;;  %132 = vmatprep.mubr.msk.f32.mxu0 %vm27_vm0, %v14_v5  ;;  %v115_v8 = vld [vmem:[%s196_s2] ss:$0 sm:$0xff] }
   0x4   :  { %136 = vmatprep.subr.bf16.mxu0 %v135_v3 }
   0x5   :  { %138 = vmatpush3.bf16.msra.mxu0 %v135_v3 }
   0x6   :  { %140 = vmatprep.subr.bf16.mxu0 %v139_v6 }
   0x9   :  { %142 = vmatpush3.bf16.msra.mxu0 %v139_v6 }
   0xc   :  { %133 = vmatmul.mubr.msk.f32.vlgmr.msra.gmra.mrb[0].mxu0 %vm27_vm0, %v15_v7 }
  0xdf   :  { %v134_v9 = vpop.f32.mrb[0].mxu0 }
  0xe0   :  { %v106_v10 = vadd.f32 %v134_v9, %v115_v8  ;;  %v100_v11 = vpop.f32.mrb[1].mxu0 }
  0xe1   :  { %v101_v12 = vadd.f32 %v115_v8, %v100_v11 }
  0xe2   :  { %110 = vst.msk [vmem:[%s197_s3 + $0x8] sm:$0xff] %vm27_vm0, %v106_v10 }
  0xe3   :  { %109 = vst.msk [vmem:[%s197_s3] sm:$0xff] %vm27_vm0, %v101_v12 }

// kernel: asl_transformer_decoder.14
= control target key start
LH: loop header
LB: loop body
LE: loop exit
PB: predicated region body
PF: predicated region fallthrough
CT: control target
= control target key end

     0   :  { %s1574_s0 = inlined_call_operand.vmem [shape: f32[16,32], index: 0, kind: input, shape index: {}]   ;;  %s1575_s1 = inlined_call_operand.vmem [shape: f32[16,32], index: 1, kind: input, shape index: {}]   ;;  %s1576_s2 = inlined_call_operand.vmem [shape: f32[32,32], index: 2, kind: input, shape index: {}]   ;;  %s1577_s3 = inlined_call_operand.vmem [shape: f32[1,32], index: 3, kind: input, shape index: {}]   ;;  %s1578_s4 = inlined_call_operand.vmem [shape: f32[1,32], index: 4, kind: input, shape index: {}]   ;;  %s1579_s5 = inlined_call_operand.vmem [shape: f32[1,32], index: 5, kind: input, shape index: {}]   ;;  %s1580_s6 = inlined_call_operand.vmem [shape: f32[32,256], index: 6, kind: input, shape index: {}]   ;;  %s1581_s7 = inlined_call_operand.vmem [shape: f32[1,256], index: 7, kind: input, shape index: {}]   ;;  %s1582_s8 = inlined_call_operand.vmem [shape: f32[256,32], index: 8, kind: input, shape index: {}]   ;;  %s1583_s9 = inlined_call_operand.vmem [shape: f32[1,32], index: 9, kind: input, shape index: {}]   ;;  %s1584_s10 = inlined_call_operand.vmem [shape: f32[1,32], index: 10, kind: input, shape index: {}]   ;;  %s1585_s11 = inlined_call_operand.vmem [shape: f32[1,32], index: 11, kind: input, shape index: {}]   ;;  %s1586_s12 = inlined_call_operand.vmem [shape: f32[16,32], index: 12, kind: output, shape index: {}]  }
   0x1   :  { %1589 = sst [smem:[#allocation7_spill]] %s1580_s6 }
   0x2   :  { %s1402_s21 = smov 0   ;;  %s1404_s22 = smov 0  }
   0x3   :  { %s1406_s23 = smov 0   ;;  %s1408_s24 = smov 0  }
   0x4   :  { %s1410_s25 = smov 0  }
   0x5 LB: > { %1590 = sst [smem:[#allocation5_spill]] %s1330_s24  ;;  %s31_s26 = sadd.s32 1, %s1330_s24  ;;  %s1334_s25 = sphi %s1410_s25, %s22_s25   ;;  %s1330_s24 = sphi %s1408_s24, %s1594_s24   ;;  %s1326_s23 = sphi %s1406_s23, %s1593_s23   ;;  %s1322_s22 = sphi %s1404_s22, %s1596_s22   ;;  %s1318_s21 = sphi %s1402_s21, %s1595_s21  }
   0x6   : > { %p32_p0 = scmp.ge.s32.totalorder %s31_s26, 2  ;;  %p184_p1 = scmp.ne.s32.totalorder %s1322_s22, %s1318_s21 }
   0x7   : > { %p185_p2 = scmp.eq.s32.totalorder %s1334_s25, 0  ;;  %s177_s28 = sadd.s32 1, %s1322_s22 }
   0x8   : > { %s1598_s26 = smov (%p32_p0, %s31_s26), 0  ;;  %p1088_p5 = scmp.ge.s32.totalorder %s1334_s25, 2 }
   0x9   : > { %1591 = sst [smem:[#allocation6_spill]] %s1598_s26  ;;  %p186_p3 = por %p185_p2, %p184_p1 }
   0xa   : > { %s174_s27 = ssub.s32 %s1330_s24, %s1598_s26  ;;  %390 = sbr.rel (%p1088_p5) target bundleno = 29 (0x1d), region = 52 }
   0xb   : > { %p175_p4 = scmp.eq.s32.totalorder %s174_s27, 0 }
   0xd   : > { %s1437_s29 = scalar_select %p175_p4, %s1322_s22, %s177_s28  }
  0x11   : > { %393 = sbr.rel (!%p186_p3) target bundleno = 29 (0x1d), region = 56  ;;  %s395_s30 = sand.u32 (%p186_p3), 1, %s1322_s22  }
  0x12   : > { %s1090_s13 = sshll.u32 (%p186_p3), %s1330_s24, 3  ;;  %s1089_s14 = sshll.u32 (%p186_p3), %s395_s30, 5 }
  0x13   : > { %s1592_s6 = sld [smem:[#allocation7_spill]] (%p186_p3)  ;;  %s397_s18 = scalar_lea.vmem (%p186_p3), [#allocation4], %s1089_s14 }
  0x19   : > { %s399_s17 = scalar_lea.vmem %s1592_s6, %s1090_s13 }
  0x1a   : > { %v433_v0 = vld [vmem:[%s399_s17] sm:$0xff]  ;;  %v435_v1 = vld [vmem:[%s399_s17 + $0x10] sm:$0xff] }
  0x1b   : > { %v437_v2 = vld [vmem:[%s399_s17 + $0x20] sm:$0xff]  ;;  %434 = vst [vmem:[%s397_s18] sm:$0xff] %v433_v0  ;;  %436 = vst [vmem:[%s397_s18 + $0x8] sm:$0xff] %v435_v1  ;;  %v439_v3 = vld [vmem:[%s399_s17 + $0x30] sm:$0xff] }
  0x1c   : > { %438 = vst [vmem:[%s397_s18 + $0x10] sm:$0xff] %v437_v2  ;;  %440 = vst [vmem:[%s397_s18 + $0x18] sm:$0xff] %v439_v3 }
  0x1d PF: > { %p1091_p6 = scmp.ge.s32.totalorder %s1334_s25, 1  ;;  %p460_p7 = scmp.lt.s32.totalorder %s1334_s25, 3 }
  0x1f   : > { %p461_p8 = pnand %p1091_p6, %p460_p7 }
  0x20   : > { %s467_s19 = sand.u32 (!%p461_p8), 1, %s1318_s21   ;;  %p538_p9 = scmp.lt.s32.totalorder (!%p461_p8), %s1326_s23, 1 }
  0x21   : > { %464 = sbr.rel (%p461_p8) target bundleno = 1362 (0x552), region = 102  ;;  %s1092_s20 = sshll.u32 (!%p461_p8), %s467_s19, 5 }
  0x22   : > { %s1093_s27 = sshll.u32 (!%p461_p8), %s1326_s23, 4  ;;  %s1462_s6 = scalar_lea.vmem (!%p461_p8), [#allocation4], %s1092_s20 }
  0x23   : > { %p542_p10 = scmp.lt.s32.totalorder (!%p461_p8), %s1093_s27, 31  ;;  %p1095_p11 = scmp.ne.s32.totalorder (!%p461_p8), %s1326_s23, 0 }
  0x28   : > { %s1451_s28 = scalar_select %p538_p9, %s1326_s23, 1 }
  0x29   : > { %s1600_s27 = smov (!%p542_p10, %s1093_s27), 31  ;;  %556 = sbr.rel (%p1095_p11) target bundleno = 588 (0x24c), region = 110 }
  0x2a   : > { %s540_s14 = scalar_lea.vmem %s1581_s7, %s1451_s28  ;;  %s1094_s15 = sshll.u32 %s1600_s27, 3  ;;  %v559_v4 = vld [vmem:[%s1576_s2] sm:$0xff] (!%p1095_p11)  ;;  %v560_v5 = vld [vmem:[%s1576_s2 + $0x8] sm:$0xff] (!%p1095_p11)  ;;  %v561_v6 = vld [vmem:[%s1576_s2 + $0x10] sm:$0xff] (!%p1095_p11)  ;;  %vm570_vm0 = vcmask (!%p1095_p11), 261120   ;;  %v1336_v10 = vmov (!%p1095_p11), 0.0  }
  0x2b   : > { %s1460_s18 = scalar_lea.vmem %s1582_s8, %s1094_s15  ;;  %v1199_v7 = vpack.c.bf16 (!%p1095_p11), %v560_v5, %v559_v4  ;;  %v562_v8 = vld [vmem:[%s1576_s2 + $0x18] sm:$0xff] (!%p1095_p11)  ;;  %v557_v9 = vld [vmem:[%s1574_s0] sm:$0xff] (!%p1095_p11)  ;;  %703 = vst.msk [vmem:[#allocation3] sm:$0xff] (!%p1095_p11), %vm570_vm0, %v1336_v10  ;;  %704 = vst.msk [vmem:[#allocation3 + $0x8] sm:$0xff] (!%p1095_p11), %vm570_vm0, %v1336_v10 }
  0x2c   : > { %v1203_v11 = vpack.c.bf16 (!%p1095_p11), %v562_v8, %v561_v6  ;;  %1150 = vmatprep.mubr.msk.f32.mxu0 (!%p1095_p11), %vm570_vm0, %v557_v9  ;;  %v558_v12 = vld [vmem:[%s1574_s0 + $0x8] sm:$0xff] (!%p1095_p11)  ;;  %v1096_v13 = vld [vmem:[%s1577_s3] ss:$0 sm:$0xff] (!%p1095_p11) }
  0x2d   : > { %1200 = vmatprep.subr.bf16.mxu0 (!%p1095_p11), %v1199_v7  ;;  %v652_v16 = vld [vmem:[%s1575_s1] sm:$0xff] (!%p1095_p11)  ;;  %v653_v19 = vld [vmem:[%s1575_s1 + $0x8] sm:$0xff] (!%p1095_p11) }
  0x2e   : > { %1202 = vmatpush3.bf16.msra.mxu0 (!%p1095_p11), %v1199_v7  ;;  %v1099_v41 = vld [vmem:[%s1578_s4] ss:$0 sm:$0xff] (!%p1095_p11) }
  0x2f   : > { %1204 = vmatprep.subr.bf16.mxu0 (!%p1095_p11), %v1203_v11  ;;  %v1100_v43 = vld [vmem:[%s1579_s5] ss:$0 sm:$0xff] (!%p1095_p11) }
  0x32   : > { %1206 = vmatpush3.bf16.msra.mxu0 %v1203_v11 }
  0x35   : > { %1151 = vmatmul.mubr.msk.f32.vlgmr.msra.gmra.mrb[0].mxu0 %vm570_vm0, %v558_v12 }
 0x108   : > { %v1152_v14 = vpop.f32.mrb[0].mxu0 }
 0x109   : > { %v643_v15 = vpop.f32.mrb[1].mxu0  ;;  %v649_v17 = vadd.f32 %v1152_v14, %v1096_v13 }
 0x10a   : > { %v644_v18 = vadd.f32 %v1096_v13, %v643_v15 }
 0x10b   : > { %v655_v22 = vadd.f32 %v653_v19, %v649_v17 }
 0x10c   : > { %v654_v20 = vadd.f32 %v652_v16, %v644_v18 }
 0x10d   : > { %v661_v23 = vsel %vm570_vm0, %v655_v22, 0.0 }
 0x10e   : > { %v658_v21 = vsel %vm570_vm0, %v654_v20, 0.0 }
 0x10f   : > { %659 = vadd.xlane.f32.xlu0 %v658_v21 }
 0x113   : > { %662 = vadd.xlane.f32.xlu0 %v661_v23 }
 0x19c   : > { %v660_v24 = vpop.xlane.xlu0 %659 }
 0x19d   : > { %v665_v25 = vmul.f32 0.03125, %v660_v24 }
 0x19f   : > { %v667_v26 = vsub.f32 %v654_v20, %v665_v25 }
 0x1a0   : > { %v663_v27 = vpop.xlane.xlu0 %662 }
 0x1a1   : > { %v666_v28 = vmul.f32 0.03125, %v663_v27  ;;  %v669_v29 = vmul.f32 %v667_v26, %v667_v26 }
 0x1a3   : > { %v668_v30 = vsub.f32 %v655_v22, %v666_v28  ;;  %v671_v31 = vsel %vm570_vm0, %v669_v29, 0.0 }
 0x1a4   : > { %672 = vadd.xlane.f32.xlu1 %v671_v31 }
 0x1a5   : > { %v670_v32 = vmul.f32 %v668_v30, %v668_v30 }
 0x1a7   : > { %v674_v33 = vsel %vm570_vm0, %v670_v32, 0.0 }
 0x1a8   : > { %675 = vadd.xlane.f32.xlu1 %v674_v33 }
 0x231   : > { %v673_v34 = vpop.xlane.xlu1 %672 }
 0x232   : > { %v677_v35 = vmul.f32 0.03125, %v673_v34 }
 0x234   : > { %v679_v36 = vadd.f32 1e-05, %v677_v35 }
 0x235   : > { %v676_v37 = vpop.xlane.xlu1 %675 }
 0x236   : > { %1288 = vrsqrt.f32 %v679_v36  ;;  %v678_v38 = vmul.f32 0.03125, %v676_v37 }
 0x238   : > { %v680_v39 = vadd.f32 1e-05, %v678_v38 }
 0x23a   : > { %1290 = vrsqrt.f32 %v680_v39 }
 0x240   : > { %v1289_v40 = vpop.eup %1288 }
 0x241   : > { %v683_v42 = vmul.f32 %v1289_v40, %v667_v26 }
 0x243   : > { %v691_v44 = vmul.f32 %v1099_v41, %v683_v42 }
 0x244   : > { %v1291_v45 = vpop.eup %1290 }
 0x245   : > { %v699_v46 = vadd.f32 %v1100_v43, %v691_v44  ;;  %v684_v47 = vmul.f32 %v1291_v45, %v668_v30 }
 0x247   : > { %701 = vst.msk [vmem:[#allocation2] sm:$0xff] %vm570_vm0, %v699_v46  ;;  %v692_v48 = vmul.f32 %v1099_v41, %v684_v47 }
 0x249   : > { %v700_v49 = vadd.f32 %v1100_v43, %v692_v48 }
 0x24b   : > { %702 = vst.msk [vmem:[#allocation2 + $0x8] sm:$0xff] %vm570_vm0, %v700_v49 }
 0x24c PF: > { %v707_v50 = vld [vmem:[%s1462_s6] sm:$0xff]  ;;  %v708_v51 = vld [vmem:[%s1462_s6 + $0x8] sm:$0xff]  ;;  %v709_v52 = vld [vmem:[%s1462_s6 + $0x10] sm:$0xff]  ;;  %vm718_vm1 = vcmask 261120   ;;  %p1104_p12 = scmp.ne.s32.totalorder %s1326_s23, 1 }
 0x24d   : > { %v1207_v53 = vpack.c.bf16 %v708_v51, %v707_v50  ;;  %v710_v54 = vld [vmem:[%s1462_s6 + $0x18] sm:$0xff]  ;;  %v804_v57 = vld [vmem:[%s1460_s18] sm:$0xff]  ;;  %v805_v58 = vld [vmem:[%s1460_s18 + $0x8] sm:$0xff] }
 0x24e   : > { %v705_v55 = vld [vmem:[#allocation2] sm:$0xff]  ;;  %v1211_v56 = vpack.c.bf16 %v710_v54, %v709_v52  ;;  %v806_v59 = vld [vmem:[%s1460_s18 + $0x10] sm:$0xff]  ;;  %v1215_v60 = vpack.c.bf16 %v805_v58, %v804_v57  ;;  %v807_v61 = vld [vmem:[%s1460_s18 + $0x18] sm:$0xff] }
 0x24f   : > { %1161 = vmatprep.mubr.msk.f32.mxu0 %vm718_vm1, %v705_v55  ;;  %1208 = vmatprep.subr.bf16.mxu0 %v1207_v53  ;;  %v1219_v62 = vpack.c.bf16 %v807_v61, %v806_v59  ;;  %v808_v63 = vld [vmem:[%s1460_s18 + $0x20] sm:$0xff]  ;;  %v809_v0 = vld [vmem:[%s1460_s18 + $0x28] sm:$0xff]  ;;  %v810_v3 = vld [vmem:[%s1460_s18 + $0x30] sm:$0xff] }
 0x250   : > { %1210 = vmatpush3.bf16.msra.mxu0 %v1207_v53  ;;  %1216 = vmatprep.subr.bf16.mxu1 %v1215_v60  ;;  %v1223_v1 = vpack.c.bf16 %v809_v0, %v808_v63  ;;  %v811_v4 = vld [vmem:[%s1460_s18 + $0x38] sm:$0xff]  ;;  %v812_v6 = vld [vmem:[%s1460_s18 + $0x40] sm:$0xff]  ;;  %v813_v7 = vld [vmem:[%s1460_s18 + $0x48] sm:$0xff] }
 0x251   : > { %1212 = vmatprep.subr.bf16.mxu0 %v1211_v56  ;;  %1218 = vmatpush3.bf16.msra.mxu1 %v1215_v60  ;;  %v1227_v5 = vpack.c.bf16 %v811_v4, %v810_v3  ;;  %v1231_v8 = vpack.c.bf16 %v813_v7, %v812_v6  ;;  %v814_v9 = vld [vmem:[%s1460_s18 + $0x50] sm:$0xff]  ;;  %v815_v10 = vld [vmem:[%s1460_s18 + $0x58] sm:$0xff]  ;;  %v816_v12 = vld [vmem:[%s1460_s18 + $0x60] sm:$0xff] }
 0x252   : > { %1220 = vmatprep.subr.bf16.mxu1 %v1219_v62  ;;  %v706_v2 = vld [vmem:[#allocation2 + $0x8] sm:$0xff]  ;;  %v1235_v11 = vpack.c.bf16 %v815_v10, %v814_v9  ;;  %v818_v15 = vld [vmem:[%s1460_s18 + $0x70] sm:$0xff]  ;;  %v819_v16 = vld [vmem:[%s1460_s18 + $0x78] sm:$0xff] }
 0x253   : > { %v817_v13 = vld [vmem:[%s1460_s18 + $0x68] sm:$0xff]  ;;  %v1243_v17 = vpack.c.bf16 %v819_v16, %v818_v15  ;;  %v1101_v18 = vld [vmem:[%s540_s14] ss:$0 sm:$0xff]  ;;  %v803_v25 = vld [vmem:[#allocation3 + $0x8] sm:$0xff] }
 0x254   : > { %1214 = vmatpush3.bf16.msra.mxu0 %v1211_v56  ;;  %v1239_v14 = vpack.c.bf16 %v817_v13, %v816_v12  ;;  %v802_v26 = vld [vmem:[#allocation3] sm:$0xff]  ;;  %v903_v31 = vld [vmem:[#allocation2] sm:$0xff] (!%p1104_p12)  ;;  %v904_v35 = vld [vmem:[#allocation2 + $0x8] sm:$0xff] (!%p1104_p12) }
 0x255   : > { %1222 = vmatpush3.bf16.msra.mxu1 %v1219_v62  ;;  %v1105_v33 = vld [vmem:[%s1583_s9] ss:$0 sm:$0xff] (!%p1104_p12) }
 0x256   : > { %1224 = vmatprep.subr.bf16.mxu1 %v1223_v1  ;;  %v1106_v59 = vld [vmem:[%s1584_s10] ss:$0 sm:$0xff] (!%p1104_p12) }
 0x257   : > { %1162 = vmatmul.mubr.msk.f32.vlgmr.msra.gmra.mrb[0].mxu0 %vm718_vm1, %v706_v2  ;;  %v1107_v61 = vld [vmem:[%s1585_s11] ss:$0 sm:$0xff] (!%p1104_p12) }
 0x259   : > { %1226 = vmatpush3.bf16.msra.mxu1 %v1223_v1 }
 0x25a   : > { %1228 = vmatprep.subr.bf16.mxu1 %v1227_v5 }
 0x25d   : > { %1230 = vmatpush3.bf16.msra.mxu1 %v1227_v5 }
 0x25e   : > { %1232 = vmatprep.subr.bf16.mxu1 %v1231_v8 }
 0x261   : > { %1234 = vmatpush3.bf16.msra.mxu1 %v1231_v8 }
 0x262   : > { %1236 = vmatprep.subr.bf16.mxu1 %v1235_v11 }
 0x265   : > { %1238 = vmatpush3.bf16.msra.mxu1 %v1235_v11 }
 0x266   : > { %1240 = vmatprep.subr.bf16.mxu1 %v1239_v14 }
 0x269   : > { %1242 = vmatpush3.bf16.msra.mxu1 %v1239_v14 }
 0x26a   : > { %1244 = vmatprep.subr.bf16.mxu1 %v1243_v17 }
 0x26d   : > { %1246 = vmatpush3.bf16.msra.mxu1 %v1243_v17 }
 0x32a   : > { %v1163_v19 = vpop.f32.mrb[0].mxu0 }
 0x32b   : > { %v797_v20 = vadd.f32 %v1163_v19, %v1101_v18  ;;  %v791_v21 = vpop.f32.mrb[1].mxu0 }
 0x32c   : > { %v792_v22 = vadd.f32 %v1101_v18, %v791_v21 }
 0x32d   : > { %v801_v24 = vmax.f32 %v797_v20, 0.0 }
 0x32e   : > { %v800_v23 = vmax.f32 %v792_v22, 0.0 }
 0x330   : > { %1196 = vmatprep.mubr.f32.mxu1 %v800_v23 }
 0x331   : > { %1197 = vmatmul.mubr.f32.vlgmr.msra.gmra.mrb[0].mxu1 %v801_v24 }
 0x402   : > { %902 = sbr.rel (%p1104_p12) target bundleno = 1362 (0x552), region = 114 }
 0x404   : > { %v1198_v27 = vpop.f32.mrb[0].mxu1 }
 0x405   : > { %v896_v28 = vadd.f32 %v1198_v27, %v803_v25  ;;  %v886_v29 = vpop.f32.mrb[1].mxu1 }
 0x406   : > { %v895_v30 = vadd.f32 %v886_v29, %v802_v26 }
 0x407   : > { %898 = vst.msk [vmem:[#allocation3 + $0x8] sm:$0xff] %vm718_vm1, %v896_v28 }
 0x408   : > { %897 = vst.msk [vmem:[#allocation3] sm:$0xff] %vm718_vm1, %v895_v30 }
 0x40e   : > { %v906_v36 = vld [vmem:[#allocation3 + $0x8] sm:$0xff] }
 0x40f   : > { %v905_v32 = vld [vmem:[#allocation3] sm:$0xff]  ;;  %v908_v37 = vadd.f32 %v906_v36, %v904_v35 }
 0x410   : > { %v907_v34 = vadd.f32 %v905_v32, %v903_v31 }
 0x411   : > { %v917_v39 = vadd.f32 %v1105_v33, %v908_v37 }
 0x412   : > { %v916_v38 = vadd.f32 %v1105_v33, %v907_v34 }
 0x413   : > { %v923_v41 = vsel %vm718_vm1, %v917_v39, 0.0 }
 0x414   : > { %v920_v40 = vsel %vm718_vm1, %v916_v38, 0.0 }
 0x415   : > { %921 = vadd.xlane.f32.xlu0 %v920_v40 }
 0x419   : > { %924 = vadd.xlane.f32.xlu0 %v923_v41 }
 0x4a2   : > { %v922_v42 = vpop.xlane.xlu0 %921 }
 0x4a3   : > { %v927_v43 = vmul.f32 0.03125, %v922_v42 }
 0x4a5   : > { %v929_v44 = vsub.f32 %v916_v38, %v927_v43 }
 0x4a6   : > { %v925_v45 = vpop.xlane.xlu0 %924 }
 0x4a7   : > { %v928_v46 = vmul.f32 0.03125, %v925_v45  ;;  %v931_v47 = vmul.f32 %v929_v44, %v929_v44 }
 0x4a9   : > { %v930_v48 = vsub.f32 %v917_v39, %v928_v46  ;;  %v933_v49 = vsel %vm718_vm1, %v931_v47, 0.0 }
 0x4aa   : > { %934 = vadd.xlane.f32.xlu1 %v933_v49 }
 0x4ab   : > { %v932_v50 = vmul.f32 %v930_v48, %v930_v48 }
 0x4ad   : > { %v936_v51 = vsel %vm718_vm1, %v932_v50, 0.0 }
 0x4ae   : > { %937 = vadd.xlane.f32.xlu1 %v936_v51 }
 0x537   : > { %v935_v52 = vpop.xlane.xlu1 %934 }
 0x538   : > { %v939_v53 = vmul.f32 0.03125, %v935_v52 }
 0x53a   : > { %v941_v54 = vadd.f32 1e-05, %v939_v53 }
 0x53b   : > { %v938_v55 = vpop.xlane.xlu1 %937 }
 0x53c   : > { %1292 = vrsqrt.f32 %v941_v54  ;;  %v940_v56 = vmul.f32 0.03125, %v938_v55 }
 0x53e   : > { %v942_v57 = vadd.f32 1e-05, %v940_v56 }
 0x540   : > { %1294 = vrsqrt.f32 %v942_v57 }
 0x546   : > { %v1293_v58 = vpop.eup %1292 }
 0x547   : > { %v945_v60 = vmul.f32 %v1293_v58, %v929_v44 }
 0x549   : > { %v953_v62 = vmul.f32 %v1106_v59, %v945_v60 }
 0x54a   : > { %v1295_v63 = vpop.eup %1294 }
 0x54b   : > { %v961_v0 = vadd.f32 %v1107_v61, %v953_v62  ;;  %v946_v1 = vmul.f32 %v1295_v63, %v930_v48 }
 0x54d   : > { %963 = vst.msk [vmem:[%s1586_s12] sm:$0xff] %vm718_vm1, %v961_v0  ;;  %v954_v2 = vmul.f32 %v1106_v59, %v946_v1 }
 0x54f   : > { %v962_v3 = vadd.f32 %v1107_v61, %v954_v2 }
 0x551   : > { %964 = vst.msk [vmem:[%s1586_s12 + $0x8] sm:$0xff] %vm718_vm1, %v962_v3 }
 0x552 PF: > { %s22_s25 = sadd.s32 1, %s1334_s25   ;;  %s1593_s23 = sld [smem:[#allocation5_spill]] }
 0x553   : > { %p19_p13 = scmp.ge.s32.totalorder %s22_s25, 4   ;;  %s1594_s24 = sld [smem:[#allocation6_spill]] }
 0x554   : > { %s1595_s21 = smov %s1322_s22  ;;  %s1596_s22 = smov %s1437_s29 }
 0x555   :  { %21 = sbr.rel (!%p19_p13) target bundleno = 5 (0x5), region = 161 }

// kernel: asl_transformer_decoder.19
= control target key start
LH: loop header
LB: loop body
LE: loop exit
PB: predicated region body
PF: predicated region fallthrough
CT: control target
= control target key end

     0   :  { %s1630_s0 = inlined_call_operand.vmem [shape: f32[16,32], index: 0, kind: input, shape index: {}]   ;;  %s1631_s1 = inlined_call_operand.vmem [shape: f32[16,32], index: 1, kind: input, shape index: {}]   ;;  %s1632_s2 = inlined_call_operand.vmem [shape: f32[32,32], index: 2, kind: input, shape index: {}]   ;;  %s1633_s3 = inlined_call_operand.vmem [shape: f32[1,32], index: 3, kind: input, shape index: {}]   ;;  %s1634_s4 = inlined_call_operand.vmem [shape: f32[1,32], index: 4, kind: input, shape index: {}]   ;;  %s1635_s5 = inlined_call_operand.vmem [shape: f32[1,32], index: 5, kind: input, shape index: {}]   ;;  %s1636_s6 = inlined_call_operand.vmem [shape: f32[32,256], index: 6, kind: input, shape index: {}]   ;;  %s1637_s7 = inlined_call_operand.vmem [shape: f32[1,256], index: 7, kind: input, shape index: {}]   ;;  %s1638_s8 = inlined_call_operand.vmem [shape: f32[256,32], index: 8, kind: input, shape index: {}]   ;;  %s1639_s9 = inlined_call_operand.vmem [shape: f32[1,32], index: 9, kind: input, shape index: {}]   ;;  %s1640_s10 = inlined_call_operand.vmem [shape: f32[1,32], index: 10, kind: input, shape index: {}]   ;;  %s1641_s11 = inlined_call_operand.vmem [shape: f32[1,32], index: 11, kind: input, shape index: {}]   ;;  %s1642_s12 = inlined_call_operand.hbm [shape: f32[16,32], index: 12, kind: output, shape index: {}]  }
   0x1   :  { %1645 = sst [smem:[#allocation10_spill]] %s1636_s6 }
   0x2   :  { %17 = vsyncpa [#allocation6], 0  ;;  %s1435_s21 = smov 0   ;;  %s1437_s22 = smov 0  }
   0x3   :  { %s1439_s23 = smov 0   ;;  %s1441_s24 = smov 0  }
   0x4   :  { %s1443_s25 = smov 0  }
   0x5 LB: > { %1646 = sst [smem:[#allocation8_spill]] %s1360_s24  ;;  %s32_s27 = sadd.s32 1, %s1360_s24  ;;  %s1364_s25 = sphi %s1443_s25, %s23_s25   ;;  %s1360_s24 = sphi %s1441_s24, %s1652_s24   ;;  %s1356_s23 = sphi %s1439_s23, %s1651_s23   ;;  %s1352_s22 = sphi %s1437_s22, %s1654_s22   ;;  %s1348_s21 = sphi %s1435_s21, %s1653_s21  }
   0x6   : > { %p33_p0 = scmp.ge.s32.totalorder %s32_s27, 2  ;;  %p185_p1 = scmp.ne.s32.totalorder %s1352_s22, %s1348_s21 }
   0x7   : > { %p186_p2 = scmp.eq.s32.totalorder %s1364_s25, 0  ;;  %s178_s29 = sadd.s32 1, %s1352_s22 }
   0x8   : > { %s1656_s27 = smov (%p33_p0, %s32_s27), 0  ;;  %p1079_p5 = scmp.ge.s32.totalorder %s1364_s25, 2 }
   0x9   : > { %1647 = sst [smem:[#allocation9_spill]] %s1656_s27  ;;  %p187_p3 = por %p186_p2, %p185_p1 }
   0xa   : > { %s175_s28 = ssub.s32 %s1360_s24, %s1656_s27  ;;  %391 = sbr.rel (%p1079_p5) target bundleno = 29 (0x1d), region = 52 }
   0xb   : > { %p176_p4 = scmp.eq.s32.totalorder %s175_s28, 0 }
   0xd   : > { %s1471_s30 = scalar_select %p176_p4, %s1352_s22, %s178_s29  }
  0x11   : > { %394 = sbr.rel (!%p187_p3) target bundleno = 29 (0x1d), region = 56  ;;  %s396_s13 = sand.u32 (%p187_p3), 1, %s1352_s22  }
  0x12   : > { %s1081_s14 = sshll.u32 (%p187_p3), %s1360_s24, 3  ;;  %s1080_s15 = sshll.u32 (%p187_p3), %s396_s13, 5 }
  0x13   : > { %s1648_s6 = sld [smem:[#allocation10_spill]] (%p187_p3)  ;;  %s398_s19 = scalar_lea.vmem (%p187_p3), [#allocation4], %s1080_s15 }
  0x19   : > { %s400_s18 = scalar_lea.vmem %s1648_s6, %s1081_s14 }
  0x1a   : > { %v434_v0 = vld [vmem:[%s400_s18] sm:$0xff]  ;;  %v436_v1 = vld [vmem:[%s400_s18 + $0x10] sm:$0xff] }
  0x1b   : > { %v438_v2 = vld [vmem:[%s400_s18 + $0x20] sm:$0xff]  ;;  %435 = vst [vmem:[%s398_s19] sm:$0xff] %v434_v0  ;;  %437 = vst [vmem:[%s398_s19 + $0x8] sm:$0xff] %v436_v1  ;;  %v440_v3 = vld [vmem:[%s400_s18 + $0x30] sm:$0xff] }
  0x1c   : > { %439 = vst [vmem:[%s398_s19 + $0x10] sm:$0xff] %v438_v2  ;;  %441 = vst [vmem:[%s398_s19 + $0x18] sm:$0xff] %v440_v3 }
  0x1d PF: > { %p1082_p6 = scmp.ge.s32.totalorder %s1364_s25, 1  ;;  %p461_p7 = scmp.lt.s32.totalorder %s1364_s25, 3 }
  0x1f   : > { %p462_p8 = pnand %p1082_p6, %p461_p7 }
  0x20   : > { %s468_s20 = sand.u32 (!%p462_p8), 1, %s1348_s21   ;;  %p534_p9 = scmp.lt.s32.totalorder (!%p462_p8), %s1356_s23, 1 }
  0x21   : > { %465 = sbr.rel (%p462_p8) target bundleno = 1388 (0x56c), region = 102  ;;  %s1083_s28 = sshll.u32 (!%p462_p8), %s468_s20, 5 }
  0x22   : > { %s1084_s29 = sshll.u32 (!%p462_p8), %s1356_s23, 4  ;;  %s1496_s6 = scalar_lea.vmem (!%p462_p8), [#allocation4], %s1083_s28 }
  0x23   : > { %p538_p10 = scmp.lt.s32.totalorder (!%p462_p8), %s1084_s29, 31  ;;  %p1086_p11 = scmp.ne.s32.totalorder (!%p462_p8), %s1356_s23, 0 }
  0x28   : > { %s1485_s13 = scalar_select %p534_p9, %s1356_s23, 1 }
  0x29   : > { %s1658_s29 = smov (!%p538_p10, %s1084_s29), 31  ;;  %547 = sbr.rel (%p1086_p11) target bundleno = 588 (0x24c), region = 110 }
  0x2a   : > { %s536_s16 = scalar_lea.vmem %s1637_s7, %s1485_s13  ;;  %s1085_s17 = sshll.u32 %s1658_s29, 3  ;;  %v550_v4 = vld [vmem:[%s1632_s2] sm:$0xff] (!%p1086_p11)  ;;  %v551_v5 = vld [vmem:[%s1632_s2 + $0x8] sm:$0xff] (!%p1086_p11)  ;;  %v552_v6 = vld [vmem:[%s1632_s2 + $0x10] sm:$0xff] (!%p1086_p11)  ;;  %vm561_vm0 = vcmask (!%p1086_p11), 261120   ;;  %v1366_v10 = vmov (!%p1086_p11), 0.0  }
  0x2b   : > { %s1494_s26 = scalar_lea.vmem %s1638_s8, %s1085_s17  ;;  %v1190_v7 = vpack.c.bf16 (!%p1086_p11), %v551_v5, %v550_v4  ;;  %v553_v8 = vld [vmem:[%s1632_s2 + $0x18] sm:$0xff] (!%p1086_p11)  ;;  %v548_v9 = vld [vmem:[%s1630_s0] sm:$0xff] (!%p1086_p11)  ;;  %694 = vst.msk [vmem:[#allocation3] sm:$0xff] (!%p1086_p11), %vm561_vm0, %v1366_v10  ;;  %695 = vst.msk [vmem:[#allocation3 + $0x8] sm:$0xff] (!%p1086_p11), %vm561_vm0, %v1366_v10 }
  0x2c   : > { %v1194_v11 = vpack.c.bf16 (!%p1086_p11), %v553_v8, %v552_v6  ;;  %1141 = vmatprep.mubr.msk.f32.mxu0 (!%p1086_p11), %vm561_vm0, %v548_v9  ;;  %v549_v12 = vld [vmem:[%s1630_s0 + $0x8] sm:$0xff] (!%p1086_p11)  ;;  %v1087_v13 = vld [vmem:[%s1633_s3] ss:$0 sm:$0xff] (!%p1086_p11) }
  0x2d   : > { %1191 = vmatprep.subr.bf16.mxu0 (!%p1086_p11), %v1190_v7  ;;  %v643_v16 = vld [vmem:[%s1631_s1] sm:$0xff] (!%p1086_p11)  ;;  %v644_v19 = vld [vmem:[%s1631_s1 + $0x8] sm:$0xff] (!%p1086_p11) }
  0x2e   : > { %1193 = vmatpush3.bf16.msra.mxu0 (!%p1086_p11), %v1190_v7  ;;  %v1090_v41 = vld [vmem:[%s1634_s4] ss:$0 sm:$0xff] (!%p1086_p11) }
  0x2f   : > { %1195 = vmatprep.subr.bf16.mxu0 (!%p1086_p11), %v1194_v11  ;;  %v1091_v43 = vld [vmem:[%s1635_s5] ss:$0 sm:$0xff] (!%p1086_p11) }
  0x32   : > { %1197 = vmatpush3.bf16.msra.mxu0 %v1194_v11 }
  0x35   : > { %1142 = vmatmul.mubr.msk.f32.vlgmr.msra.gmra.mrb[0].mxu0 %vm561_vm0, %v549_v12 }
 0x108   : > { %v1143_v14 = vpop.f32.mrb[0].mxu0 }
 0x109   : > { %v634_v15 = vpop.f32.mrb[1].mxu0  ;;  %v640_v17 = vadd.f32 %v1143_v14, %v1087_v13 }
 0x10a   : > { %v635_v18 = vadd.f32 %v1087_v13, %v634_v15 }
 0x10b   : > { %v646_v22 = vadd.f32 %v644_v19, %v640_v17 }
 0x10c   : > { %v645_v20 = vadd.f32 %v643_v16, %v635_v18 }
 0x10d   : > { %v652_v23 = vsel %vm561_vm0, %v646_v22, 0.0 }
 0x10e   : > { %v649_v21 = vsel %vm561_vm0, %v645_v20, 0.0 }
 0x10f   : > { %650 = vadd.xlane.f32.xlu0 %v649_v21 }
 0x113   : > { %653 = vadd.xlane.f32.xlu0 %v652_v23 }
 0x19c   : > { %v651_v24 = vpop.xlane.xlu0 %650 }
 0x19d   : > { %v656_v25 = vmul.f32 0.03125, %v651_v24 }
 0x19f   : > { %v658_v26 = vsub.f32 %v645_v20, %v656_v25 }
 0x1a0   : > { %v654_v27 = vpop.xlane.xlu0 %653 }
 0x1a1   : > { %v657_v28 = vmul.f32 0.03125, %v654_v27  ;;  %v660_v29 = vmul.f32 %v658_v26, %v658_v26 }
 0x1a3   : > { %v659_v30 = vsub.f32 %v646_v22, %v657_v28  ;;  %v662_v31 = vsel %vm561_vm0, %v660_v29, 0.0 }
 0x1a4   : > { %663 = vadd.xlane.f32.xlu1 %v662_v31 }
 0x1a5   : > { %v661_v32 = vmul.f32 %v659_v30, %v659_v30 }
 0x1a7   : > { %v665_v33 = vsel %vm561_vm0, %v661_v32, 0.0 }
 0x1a8   : > { %666 = vadd.xlane.f32.xlu1 %v665_v33 }
 0x231   : > { %v664_v34 = vpop.xlane.xlu1 %663 }
 0x232   : > { %v668_v35 = vmul.f32 0.03125, %v664_v34 }
 0x234   : > { %v670_v36 = vadd.f32 1e-05, %v668_v35 }
 0x235   : > { %v667_v37 = vpop.xlane.xlu1 %666 }
 0x236   : > { %1288 = vrsqrt.f32 %v670_v36  ;;  %v669_v38 = vmul.f32 0.03125, %v667_v37 }
 0x238   : > { %v671_v39 = vadd.f32 1e-05, %v669_v38 }
 0x23a   : > { %1290 = vrsqrt.f32 %v671_v39 }
 0x240   : > { %v1289_v40 = vpop.eup %1288 }
 0x241   : > { %v674_v42 = vmul.f32 %v1289_v40, %v658_v26 }
 0x243   : > { %v682_v44 = vmul.f32 %v1090_v41, %v674_v42 }
 0x244   : > { %v1291_v45 = vpop.eup %1290 }
 0x245   : > { %v690_v46 = vadd.f32 %v1091_v43, %v682_v44  ;;  %v675_v47 = vmul.f32 %v1291_v45, %v659_v30 }
 0x247   : > { %692 = vst.msk [vmem:[#allocation2] sm:$0xff] %vm561_vm0, %v690_v46  ;;  %v683_v48 = vmul.f32 %v1090_v41, %v675_v47 }
 0x249   : > { %v691_v49 = vadd.f32 %v1091_v43, %v683_v48 }
 0x24b   : > { %693 = vst.msk [vmem:[#allocation2 + $0x8] sm:$0xff] %vm561_vm0, %v691_v49 }
 0x24c PF: > { %v698_v50 = vld [vmem:[%s1496_s6] sm:$0xff]  ;;  %v699_v51 = vld [vmem:[%s1496_s6 + $0x8] sm:$0xff]  ;;  %v700_v52 = vld [vmem:[%s1496_s6 + $0x10] sm:$0xff]  ;;  %vm709_vm1 = vcmask 261120   ;;  %p1095_p12 = scmp.ne.s32.totalorder %s1356_s23, 1 }
 0x24d   : > { %v1198_v53 = vpack.c.bf16 %v699_v51, %v698_v50  ;;  %v701_v54 = vld [vmem:[%s1496_s6 + $0x18] sm:$0xff]  ;;  %v795_v57 = vld [vmem:[%s1494_s26] sm:$0xff]  ;;  %v796_v58 = vld [vmem:[%s1494_s26 + $0x8] sm:$0xff] }
 0x24e   : > { %v696_v55 = vld [vmem:[#allocation2] sm:$0xff]  ;;  %v1202_v56 = vpack.c.bf16 %v701_v54, %v700_v52  ;;  %v797_v59 = vld [vmem:[%s1494_s26 + $0x10] sm:$0xff]  ;;  %v1206_v60 = vpack.c.bf16 %v796_v58, %v795_v57  ;;  %v798_v61 = vld [vmem:[%s1494_s26 + $0x18] sm:$0xff] }
 0x24f   : > { %1152 = vmatprep.mubr.msk.f32.mxu0 %vm709_vm1, %v696_v55  ;;  %1199 = vmatprep.subr.bf16.mxu0 %v1198_v53  ;;  %v1210_v62 = vpack.c.bf16 %v798_v61, %v797_v59  ;;  %v799_v63 = vld [vmem:[%s1494_s26 + $0x20] sm:$0xff]  ;;  %v800_v0 = vld [vmem:[%s1494_s26 + $0x28] sm:$0xff]  ;;  %v801_v3 = vld [vmem:[%s1494_s26 + $0x30] sm:$0xff] }
 0x250   : > { %1201 = vmatpush3.bf16.msra.mxu0 %v1198_v53  ;;  %1207 = vmatprep.subr.bf16.mxu1 %v1206_v60  ;;  %v1214_v1 = vpack.c.bf16 %v800_v0, %v799_v63  ;;  %v802_v4 = vld [vmem:[%s1494_s26 + $0x38] sm:$0xff]  ;;  %v803_v6 = vld [vmem:[%s1494_s26 + $0x40] sm:$0xff]  ;;  %v804_v7 = vld [vmem:[%s1494_s26 + $0x48] sm:$0xff] }
 0x251   : > { %1203 = vmatprep.subr.bf16.mxu0 %v1202_v56  ;;  %1209 = vmatpush3.bf16.msra.mxu1 %v1206_v60  ;;  %v1218_v5 = vpack.c.bf16 %v802_v4, %v801_v3  ;;  %v1222_v8 = vpack.c.bf16 %v804_v7, %v803_v6  ;;  %v805_v9 = vld [vmem:[%s1494_s26 + $0x50] sm:$0xff]  ;;  %v806_v10 = vld [vmem:[%s1494_s26 + $0x58] sm:$0xff]  ;;  %v807_v12 = vld [vmem:[%s1494_s26 + $0x60] sm:$0xff] }
 0x252   : > { %1211 = vmatprep.subr.bf16.mxu1 %v1210_v62  ;;  %v697_v2 = vld [vmem:[#allocation2 + $0x8] sm:$0xff]  ;;  %v1226_v11 = vpack.c.bf16 %v806_v10, %v805_v9  ;;  %v809_v15 = vld [vmem:[%s1494_s26 + $0x70] sm:$0xff]  ;;  %v810_v16 = vld [vmem:[%s1494_s26 + $0x78] sm:$0xff] }
 0x253   : > { %v808_v13 = vld [vmem:[%s1494_s26 + $0x68] sm:$0xff]  ;;  %v1234_v17 = vpack.c.bf16 %v810_v16, %v809_v15  ;;  %v1092_v18 = vld [vmem:[%s536_s16] ss:$0 sm:$0xff]  ;;  %v794_v25 = vld [vmem:[#allocation3 + $0x8] sm:$0xff] }
 0x254   : > { %1205 = vmatpush3.bf16.msra.mxu0 %v1202_v56  ;;  %v1230_v14 = vpack.c.bf16 %v808_v13, %v807_v12  ;;  %v793_v26 = vld [vmem:[#allocation3] sm:$0xff]  ;;  %v894_v31 = vld [vmem:[#allocation2] sm:$0xff] (!%p1095_p12)  ;;  %v895_v35 = vld [vmem:[#allocation2 + $0x8] sm:$0xff] (!%p1095_p12) }
 0x255   : > { %1213 = vmatpush3.bf16.msra.mxu1 %v1210_v62  ;;  %v1096_v33 = vld [vmem:[%s1639_s9] ss:$0 sm:$0xff] (!%p1095_p12) }
 0x256   : > { %1215 = vmatprep.subr.bf16.mxu1 %v1214_v1  ;;  %v1097_v59 = vld [vmem:[%s1640_s10] ss:$0 sm:$0xff] (!%p1095_p12) }
 0x257   : > { %1153 = vmatmul.mubr.msk.f32.vlgmr.msra.gmra.mrb[0].mxu0 %vm709_vm1, %v697_v2  ;;  %v1098_v61 = vld [vmem:[%s1641_s11] ss:$0 sm:$0xff] (!%p1095_p12) }
 0x259   : > { %1217 = vmatpush3.bf16.msra.mxu1 %v1214_v1 }
 0x25a   : > { %1219 = vmatprep.subr.bf16.mxu1 %v1218_v5 }
 0x25d   : > { %1221 = vmatpush3.bf16.msra.mxu1 %v1218_v5 }
 0x25e   : > { %1223 = vmatprep.subr.bf16.mxu1 %v1222_v8 }
 0x261   : > { %1225 = vmatpush3.bf16.msra.mxu1 %v1222_v8 }
 0x262   : > { %1227 = vmatprep.subr.bf16.mxu1 %v1226_v11 }
 0x265   : > { %1229 = vmatpush3.bf16.msra.mxu1 %v1226_v11 }
 0x266   : > { %1231 = vmatprep.subr.bf16.mxu1 %v1230_v14 }
 0x269   : > { %1233 = vmatpush3.bf16.msra.mxu1 %v1230_v14 }
 0x26a   : > { %1235 = vmatprep.subr.bf16.mxu1 %v1234_v17 }
 0x26d   : > { %1237 = vmatpush3.bf16.msra.mxu1 %v1234_v17 }
 0x32a   : > { %v1154_v19 = vpop.f32.mrb[0].mxu0 }
 0x32b   : > { %v788_v20 = vadd.f32 %v1154_v19, %v1092_v18  ;;  %v782_v21 = vpop.f32.mrb[1].mxu0 }
 0x32c   : > { %v783_v22 = vadd.f32 %v1092_v18, %v782_v21 }
 0x32d   : > { %v792_v24 = vmax.f32 %v788_v20, 0.0 }
 0x32e   : > { %v791_v23 = vmax.f32 %v783_v22, 0.0 }
 0x330   : > { %1187 = vmatprep.mubr.f32.mxu1 %v791_v23 }
 0x331   : > { %1188 = vmatmul.mubr.f32.vlgmr.msra.gmra.mrb[0].mxu1 %v792_v24 }
 0x402   : > { %893 = sbr.rel (%p1095_p12) target bundleno = 1362 (0x552), region = 114 }
 0x404   : > { %v1189_v27 = vpop.f32.mrb[0].mxu1 }
 0x405   : > { %v887_v28 = vadd.f32 %v1189_v27, %v794_v25  ;;  %v877_v29 = vpop.f32.mrb[1].mxu1 }
 0x406   : > { %v886_v30 = vadd.f32 %v877_v29, %v793_v26 }
 0x407   : > { %889 = vst.msk [vmem:[#allocation3 + $0x8] sm:$0xff] %vm709_vm1, %v887_v28 }
 0x408   : > { %888 = vst.msk [vmem:[#allocation3] sm:$0xff] %vm709_vm1, %v886_v30 }
 0x40e   : > { %v897_v36 = vld [vmem:[#allocation3 + $0x8] sm:$0xff] }
 0x40f   : > { %v896_v32 = vld [vmem:[#allocation3] sm:$0xff]  ;;  %v899_v37 = vadd.f32 %v897_v36, %v895_v35 }
 0x410   : > { %v898_v34 = vadd.f32 %v896_v32, %v894_v31 }
 0x411   : > { %v908_v39 = vadd.f32 %v1096_v33, %v899_v37 }
 0x412   : > { %v907_v38 = vadd.f32 %v1096_v33, %v898_v34 }
 0x413   : > { %v914_v41 = vsel %vm709_vm1, %v908_v39, 0.0 }
 0x414   : > { %v911_v40 = vsel %vm709_vm1, %v907_v38, 0.0 }
 0x415   : > { %912 = vadd.xlane.f32.xlu0 %v911_v40 }
 0x419   : > { %915 = vadd.xlane.f32.xlu0 %v914_v41 }
 0x4a2   : > { %v913_v42 = vpop.xlane.xlu0 %912 }
 0x4a3   : > { %v918_v43 = vmul.f32 0.03125, %v913_v42 }
 0x4a5   : > { %v920_v44 = vsub.f32 %v907_v38, %v918_v43 }
 0x4a6   : > { %v916_v45 = vpop.xlane.xlu0 %915 }
 0x4a7   : > { %v919_v46 = vmul.f32 0.03125, %v916_v45  ;;  %v922_v47 = vmul.f32 %v920_v44, %v920_v44 }
 0x4a9   : > { %v921_v48 = vsub.f32 %v908_v39, %v919_v46  ;;  %v924_v49 = vsel %vm709_vm1, %v922_v47, 0.0 }
 0x4aa   : > { %925 = vadd.xlane.f32.xlu1 %v924_v49 }
 0x4ab   : > { %v923_v50 = vmul.f32 %v921_v48, %v921_v48 }
 0x4ad   : > { %v927_v51 = vsel %vm709_vm1, %v923_v50, 0.0 }
 0x4ae   : > { %928 = vadd.xlane.f32.xlu1 %v927_v51 }
 0x537   : > { %v926_v52 = vpop.xlane.xlu1 %925 }
 0x538   : > { %v930_v53 = vmul.f32 0.03125, %v926_v52 }
 0x53a   : > { %v932_v54 = vadd.f32 1e-05, %v930_v53 }
 0x53b   : > { %v929_v55 = vpop.xlane.xlu1 %928 }
 0x53c   : > { %1292 = vrsqrt.f32 %v932_v54  ;;  %v931_v56 = vmul.f32 0.03125, %v929_v55 }
 0x53e   : > { %v933_v57 = vadd.f32 1e-05, %v931_v56 }
 0x540   : > { %1294 = vrsqrt.f32 %v933_v57 }
 0x546   : > { %v1293_v58 = vpop.eup %1292 }
 0x547   : > { %v936_v60 = vmul.f32 %v1293_v58, %v920_v44 }
 0x549   : > { %v944_v62 = vmul.f32 %v1097_v59, %v936_v60 }
 0x54a   : > { %v1295_v63 = vpop.eup %1294 }
 0x54b   : > { %v952_v0 = vadd.f32 %v1098_v61, %v944_v62  ;;  %v937_v1 = vmul.f32 %v1295_v63, %v921_v48 }
 0x54d   : > { %954 = vst.msk [vmem:[#allocation5] sm:$0xff] %vm709_vm1, %v952_v0  ;;  %v945_v2 = vmul.f32 %v1097_v59, %v937_v1 }
 0x54f   : > { %v953_v3 = vadd.f32 %v1098_v61, %v945_v2 }
 0x551   : > { %955 = vst.msk [vmem:[#allocation5 + $0x8] sm:$0xff] %vm709_vm1, %v953_v3 }
 0x552 PF: > { %s1649_s20 = sadd.s32 4294967295, %s1364_s25   ;;  %s1367_s29 = smov [#allocation5]  }
 0x553   : > { %p1589_p13 = scmp.eq.s32.totalorder %s1649_s20, 1  ;;  %s965_s15 = sshll.u32 %s1367_s29, 4  ;;  %s966_s15 = int_to_ptr.vmem [resolvable:$true] %s965_s15 }
 0x554   : > { %s1296_s28 = scalar_lea.vmem %s966_s15, 256  ;;  %p1303_p3 = scmp.lt.s32.totalorder %s966_s15, %s966_s15 }
 0x555   : > { %p1297_p0 = scmp.ne.s32.totalorder %s966_s15, %s1296_s28  ;;  %p1304_p4 = scmp.lt.s32.totalorder %s1296_s28, %s1296_s28 }
 0x557   : > { %p1298_p1 = pnand %p1297_p0, %p1589_p13  ;;  %p1305_p5 = por %p1304_p4, %p1303_p3 }
 0x559   : > { %p1299_p2 = pneg %p1298_p1 }
 0x55b   : > { %p1306_p6 = pnand %p1305_p5, %p1299_p2 }
 0x55d   : > { %1309 = shalt.err (!%p1306_p6)
}
 0x55e   : > { %s1310_s24 = scalar_lea.hbm %s1642_s12, 256 }
 0x55f   : > { %p1311_p7 = scmp.ne.s32.totalorder %s1642_s12, %s1310_s24  ;;  %p1316_p10 = scmp.lt.u32.totalorder %s1310_s24, %s1642_s12 }
 0x561   : > { %p1312_p8 = pnand %p1311_p7, %p1589_p13 }
 0x563   : > { %p1313_p9 = pneg %p1312_p8 }
 0x565   : > { %p1318_p11 = pnand %p1316_p10, %p1313_p9 }
 0x567   : > { %1321 = shalt.err (!%p1318_p11)
}
 0x568   : > { %s1368_s23 = smov 128   ;;  %s1369_s16 = smov 8  }
 0x569   : > { %1239 = dma.vmem_to_hbm [thread:$0]  (%p1589_p13), %s966_s15, 256, %s1642_s12, [#allocation6], %s1368_s23, %s1368_s23, %s1369_s16  }
 0x56a   : > { %1343 = dma.done.wait (%p1589_p13), [#allocation6], 256  }
 0x56b   : > { %1345 = vsyncadd (%p1589_p13), [#allocation6], 4294967040 }
 0x56c PF: > { %s23_s25 = sadd.s32 1, %s1364_s25   ;;  %s1651_s23 = sld [smem:[#allocation8_spill]] }
 0x56d   : > { %p20_p12 = scmp.ge.s32.totalorder %s23_s25, 4   ;;  %s1652_s24 = sld [smem:[#allocation9_spill]] }
 0x56e   : > { %s1653_s21 = smov %s1352_s22  ;;  %s1654_s22 = smov %s1471_s30 }
 0x56f   :  { %22 = sbr.rel (!%p20_p12) target bundleno = 5 (0x5), region = 159 }
 0x576   :  { %981 = vsyncpa [#allocation6], 1 }
 0x577   :  { %983 = vsyncpa [#allocation6 + $0x1], 1 }

</bundles_post_ra>
